<compile_context>
chip_gen: v7x
topology: tpu7x:2x2x1
jax: 0.10.0
libtpu: 0.0.40
codegen_flags: <defaults>
</compile_context>

<pallas_src>
import functools

import jax
import jax.numpy as jnp
from jax.experimental import pallas as pl
from jax.experimental.pallas import tpu as pltpu

LANE = 128
SUBLANE = 8


def _round_up(n, m):
    return (n + m - 1) // m * m


def encoder_kernel(x_ref, w1_ref, b1_ref, w2_ref, b2_ref, w3_ref, b3_ref, o_ref):
    # Weights arrive as bf16 (streamed once, resident in VMEM); activations are
    # cast to bf16 only at the MXU boundary; accumulation + bias/ReLU stay f32.
    x = x_ref[...].astype(jnp.bfloat16)
    h1 = jnp.dot(x, w1_ref[...], preferred_element_type=jnp.float32)
    h1 = jnp.maximum(h1 + b1_ref[...], 0.0)
    h2 = jnp.dot(h1.astype(jnp.bfloat16), w2_ref[...],
                 preferred_element_type=jnp.float32)
    h2 = jnp.maximum(h2 + b2_ref[...], 0.0)
    h3 = jnp.dot(h2.astype(jnp.bfloat16), w3_ref[...],
                 preferred_element_type=jnp.float32)
    o_ref[...] = (h3 + b3_ref[...]).astype(o_ref.dtype)


@functools.partial(jax.jit, static_argnums=(2,))
def encoder_forward(x, params, out_dim):
    """x: [B, in_dim] f32. params: output of prepare_encoder_params.
    Returns [B, out_dim] f32."""
    w1, b1, w2, b2, w3, b3 = params
    B, in_dim = x.shape
    in_pad = w1.shape[0]
    d1, d2, d3 = w1.shape[1], w2.shape[1], w3.shape[1]

    if in_dim != in_pad:                       # lane-pad input features if needed
        x = jnp.pad(x, ((0, 0), (0, in_pad - in_dim)))

    # Batch tile: MXU-aligned when the batch is large, minimal sublane multiple
    # when it is tiny (B=2 -> TM=8, a single grid step).
    tm = 128 if B >= 128 else _round_up(B, SUBLANE)
    b_pad = _round_up(B, tm)
    if b_pad != B:
        x = jnp.pad(x, ((0, b_pad - B), (0, 0)))

    # FLOPs / bytes hint for XLA's scheduler around the custom call.
    flops = 2 * b_pad * (in_pad * d1 + d1 * d2 + d2 * d3)
    bytes_accessed = (
        x.size * 4 + b_pad * d3 * 4                      # activations in/out (f32)
        + (w1.size + w2.size + w3.size) * 2              # bf16 weights
        + (b1.size + b2.size + b3.size) * 4)             # f32 biases

    out = pl.pallas_call(
        encoder_kernel,
        out_shape=jax.ShapeDtypeStruct((b_pad, d3), jnp.float32),
        grid=(b_pad // tm,),
        in_specs=[
            pl.BlockSpec((tm, in_pad), lambda i: (i, 0)),   # x: tiled over batch
            pl.BlockSpec((in_pad, d1), lambda i: (0, 0)),   # w1: resident
            pl.BlockSpec((1, d1), lambda i: (0, 0)),        # b1
            pl.BlockSpec((d1, d2), lambda i: (0, 0)),       # w2: resident
            pl.BlockSpec((1, d2), lambda i: (0, 0)),        # b2
            pl.BlockSpec((d2, d3), lambda i: (0, 0)),       # w3: resident
            pl.BlockSpec((1, d3), lambda i: (0, 0)),        # b3
        ],
        out_specs=pl.BlockSpec((tm, d3), lambda i: (i, 0)),
        compiler_params=pltpu.CompilerParams(
            dimension_semantics=("parallel",),
        ),
        cost_estimate=pl.CostEstimate(
            flops=flops, transcendentals=0, bytes_accessed=bytes_accessed),
    )(x, w1, b1, w2, b2, w3, b3)
    return out[:B, :out_dim]


def init_linear_params(key, in_features, out_features):
    """PyTorch nn.Linear default init: U(-1/sqrt(fan_in), 1/sqrt(fan_in))."""
    kw, kb = jax.random.split(key)
    bound = 1.0 / jnp.sqrt(jnp.float32(in_features))
    # stored as [in, out] so the kernel computes x @ W (== x @ weight.T in torch)
    w = jax.random.uniform(kw, (in_features, out_features), jnp.float32,
                           minval=-bound, maxval=bound)
    b = jax.random.uniform(kb, (1, out_features), jnp.float32,
                           minval=-bound, maxval=bound)
    return w, b


def _pad_to(arr, rows, cols):
    r, c = arr.shape
    return jnp.pad(arr, ((0, rows - r), (0, cols - c)))


def prepare_encoder_params(raw):
    """One-time weight prep (outside the hot path): pad every feature dim to a
    multiple of 128 and cast weights to bf16. Biases stay f32 (VPU math)."""
    (w1, b1), (w2, b2), (w3, b3) = raw
    in_pad = _round_up(w1.shape[0], LANE)
    d1 = _round_up(w1.shape[1], LANE)
    d2 = _round_up(w2.shape[1], LANE)
    d3 = _round_up(w3.shape[1], LANE)
    w1p = _pad_to(w1, in_pad, d1).astype(jnp.bfloat16)
    b1p = _pad_to(b1, 1, d1)
    w2p = _pad_to(w2, d1, d2).astype(jnp.bfloat16)
    b2p = _pad_to(b2, 1, d2)
    w3p = _pad_to(w3, d2, d3).astype(jnp.bfloat16)
    b3p = _pad_to(b3, 1, d3)
    return (w1p, b1p, w2p, b2p, w3p, b3p)


def reference_forward(x, params, out_dim):
    """Pure-JAX reference using the same bf16-prepared weights."""
    w1, b1, w2, b2, w3, b3 = params
    h1 = jnp.maximum(
        jnp.dot(x.astype(jnp.bfloat16), w1, preferred_element_type=jnp.float32) + b1, 0.0)
    h2 = jnp.maximum(
        jnp.dot(h1.astype(jnp.bfloat16), w2, preferred_element_type=jnp.float32) + b2, 0.0)
    h3 = jnp.dot(h2.astype(jnp.bfloat16), w3, preferred_element_type=jnp.float32) + b3
    return h3[:, :out_dim]


if __name__ == "__main__":
    width, height = 16, 16          # small synthetic image size
    batch = 2
    in_dim = width * height         # 256

    key = jax.random.PRNGKey(0)
    kx, k1, k2, k3 = jax.random.split(key, 4)

    x = jax.random.normal(kx, (batch, in_dim), jnp.float32)
    raw_params = (init_linear_params(k1, in_dim, 1000),
                  init_linear_params(k2, 1000, 500),
                  init_linear_params(k3, 500, 50))
    params = prepare_encoder_params(raw_params)   # once, outside the hot path

    out = encoder_forward(x, params, 50)
    out = jax.block_until_ready(out)

    # correctness: kernel vs the same bf16-weight pure-JAX forward
    ref = reference_forward(x, params, 50)
    assert out.shape == (batch, 50)
    assert jnp.allclose(out, ref, atol=1e-2, rtol=1e-2), \
        float(jnp.max(jnp.abs(out - ref)))

    # sanity: bf16-weight path stays close to the full-f32 PyTorch-style forward
    (w1, b1), (w2, b2), (w3, b3) = raw_params
    h1 = jnp.maximum(x @ w1 + b1, 0.0)
    h2 = jnp.maximum(h1 @ w2 + b2, 0.0)
    ref_f32 = h2 @ w3 + b3
    assert float(jnp.max(jnp.abs(out - ref_f32))) < 0.1

    print("KERNEL_OK")
</pallas_src>

<mosaic_0001>
module attributes {stable_mosaic.version = 11 : i64} {
  func.func @encoder_kernel(%arg0: i32, %arg1: memref<8x256xf32, #tpu.memory_space<vmem>>, %arg2: memref<256x1024xbf16, #tpu.memory_space<vmem>>, %arg3: memref<1x1024xf32, #tpu.memory_space<vmem>>, %arg4: memref<1024x512xbf16, #tpu.memory_space<vmem>>, %arg5: memref<1x512xf32, #tpu.memory_space<vmem>>, %arg6: memref<512x128xbf16, #tpu.memory_space<vmem>>, %arg7: memref<1x128xf32, #tpu.memory_space<vmem>>, %arg8: memref<8x128xf32, #tpu.memory_space<vmem>>) attributes {dimension_semantics = [#tpu.dimension_semantics<parallel>], iteration_bounds = array<i64: 1>, scalar_prefetch = 0 : i64, scratch_operands = 0 : i64, tpu.core_type = #tpu.core_type<tc>, window_params = [{transform_indices = @transform_0, window_bounds = array<i64: 8, 256>}, {pipeline_mode = #tpu.pipeline_mode<synchronous>, transform_indices = @transform_1, window_bounds = array<i64: 256, 1024>}, {pipeline_mode = #tpu.pipeline_mode<synchronous>, transform_indices = @transform_2, window_bounds = array<i64: 1, 1024>}, {pipeline_mode = #tpu.pipeline_mode<synchronous>, transform_indices = @transform_3, window_bounds = array<i64: 1024, 512>}, {pipeline_mode = #tpu.pipeline_mode<synchronous>, transform_indices = @transform_4, window_bounds = array<i64: 1, 512>}, {pipeline_mode = #tpu.pipeline_mode<synchronous>, transform_indices = @transform_5, window_bounds = array<i64: 512, 128>}, {pipeline_mode = #tpu.pipeline_mode<synchronous>, transform_indices = @transform_6, window_bounds = array<i64: 1, 128>}, {transform_indices = @transform_7, window_bounds = array<i64: 8, 128>}]} {
    %c0 = arith.constant 0 : index
    %c0_0 = arith.constant 0 : index
    %0 = vector.load %arg1[%c0, %c0_0] : memref<8x256xf32, #tpu.memory_space<vmem>>, vector<8x256xf32>
    %1 = arith.truncf %0 : vector<8x256xf32> to vector<8x256xbf16>
    %c0_1 = arith.constant 0 : index
    %c0_2 = arith.constant 0 : index
    %2 = vector.load %arg2[%c0_1, %c0_2] : memref<256x1024xbf16, #tpu.memory_space<vmem>>, vector<256x1024xbf16>
    %cst = arith.constant dense<0.000000e+00> : vector<8x1024xf32>
    %3 = tpu.matmul %1, %2, %cst {dimension_numbers = #tpu.dot_dimension_numbers<[1], [0], [0], [1], [0, 0, 1, 1], [], []>} : vector<8x256xbf16>, vector<256x1024xbf16>, vector<8x1024xf32> -> vector<8x1024xf32>
    %c0_3 = arith.constant 0 : index
    %c0_4 = arith.constant 0 : index
    %4 = vector.load %arg3[%c0_3, %c0_4] : memref<1x1024xf32, #tpu.memory_space<vmem>>, vector<1x1024xf32>
    %5 = vector.broadcast %4 : vector<1x1024xf32> to vector<8x1024xf32>
    %6 = arith.addf %3, %5 : vector<8x1024xf32>
    %cst_5 = arith.constant 0.000000e+00 : f32
    %7 = vector.broadcast %cst_5 : f32 to vector<8x1024xf32>
    %8 = arith.maximumf %6, %7 : vector<8x1024xf32>
    %9 = arith.truncf %8 : vector<8x1024xf32> to vector<8x1024xbf16>
    %c0_6 = arith.constant 0 : index
    %c0_7 = arith.constant 0 : index
    %10 = vector.load %arg4[%c0_6, %c0_7] : memref<1024x512xbf16, #tpu.memory_space<vmem>>, vector<1024x512xbf16>
    %cst_8 = arith.constant dense<0.000000e+00> : vector<8x512xf32>
    %11 = tpu.matmul %9, %10, %cst_8 {dimension_numbers = #tpu.dot_dimension_numbers<[1], [0], [0], [1], [0, 0, 1, 1], [], []>} : vector<8x1024xbf16>, vector<1024x512xbf16>, vector<8x512xf32> -> vector<8x512xf32>
    %c0_9 = arith.constant 0 : index
    %c0_10 = arith.constant 0 : index
    %12 = vector.load %arg5[%c0_9, %c0_10] : memref<1x512xf32, #tpu.memory_space<vmem>>, vector<1x512xf32>
    %13 = vector.broadcast %12 : vector<1x512xf32> to vector<8x512xf32>
    %14 = arith.addf %11, %13 : vector<8x512xf32>
    %cst_11 = arith.constant 0.000000e+00 : f32
    %15 = vector.broadcast %cst_11 : f32 to vector<8x512xf32>
    %16 = arith.maximumf %14, %15 : vector<8x512xf32>
    %17 = arith.truncf %16 : vector<8x512xf32> to vector<8x512xbf16>
    %c0_12 = arith.constant 0 : index
    %c0_13 = arith.constant 0 : index
    %18 = vector.load %arg6[%c0_12, %c0_13] : memref<512x128xbf16, #tpu.memory_space<vmem>>, vector<512x128xbf16>
    %cst_14 = arith.constant dense<0.000000e+00> : vector<8x128xf32>
    %19 = tpu.matmul %17, %18, %cst_14 {dimension_numbers = #tpu.dot_dimension_numbers<[1], [0], [0], [1], [0, 0, 1, 1], [], []>} : vector<8x512xbf16>, vector<512x128xbf16>, vector<8x128xf32> -> vector<8x128xf32>
    %c0_15 = arith.constant 0 : index
    %c0_16 = arith.constant 0 : index
    %20 = vector.load %arg7[%c0_15, %c0_16] : memref<1x128xf32, #tpu.memory_space<vmem>>, vector<1x128xf32>
    %21 = vector.broadcast %20 : vector<1x128xf32> to vector<8x128xf32>
    %22 = arith.addf %19, %21 : vector<8x128xf32>
    %c0_17 = arith.constant 0 : index
    %c0_18 = arith.constant 0 : index
    %23 = vector.load %arg8[%c0_17, %c0_18] : memref<8x128xf32, #tpu.memory_space<vmem>>, vector<8x128xf32>
    tpu.vector_store %arg8[%c0_17, %c0_18], %22 {strides = array<i32>} : memref<8x128xf32, #tpu.memory_space<vmem>>, vector<8x128xf32>,
    return
  }
  func.func @transform_0(%arg0: i32) -> (i32, i32) {
    %c0_i32 = arith.constant 0 : i32
    %c0_i32_0 = arith.constant 0 : i32
    return %arg0, %c0_i32 : i32, i32
  }
  func.func @transform_1(%arg0: i32) -> (i32, i32) {
    %c0_i32 = arith.constant 0 : i32
    %c0_i32_0 = arith.constant 0 : i32
    %c0_i32_1 = arith.constant 0 : i32
    return %c0_i32, %c0_i32_0 : i32, i32
  }
  func.func @transform_2(%arg0: i32) -> (i32, i32) {
    %c0_i32 = arith.constant 0 : i32
    %c0_i32_0 = arith.constant 0 : i32
    %c0_i32_1 = arith.constant 0 : i32
    return %c0_i32, %c0_i32_0 : i32, i32
  }
  func.func @transform_3(%arg0: i32) -> (i32, i32) {
    %c0_i32 = arith.constant 0 : i32
    %c0_i32_0 = arith.constant 0 : i32
    %c0_i32_1 = arith.constant 0 : i32
    return %c0_i32, %c0_i32_0 : i32, i32
  }
  func.func @transform_4(%arg0: i32) -> (i32, i32) {
    %c0_i32 = arith.constant 0 : i32
    %c0_i32_0 = arith.constant 0 : i32
    %c0_i32_1 = arith.constant 0 : i32
    return %c0_i32, %c0_i32_0 : i32, i32
  }
  func.func @transform_5(%arg0: i32) -> (i32, i32) {
    %c0_i32 = arith.constant 0 : i32
    %c0_i32_0 = arith.constant 0 : i32
    %c0_i32_1 = arith.constant 0 : i32
    return %c0_i32, %c0_i32_0 : i32, i32
  }
  func.func @transform_6(%arg0: i32) -> (i32, i32) {
    %c0_i32 = arith.constant 0 : i32
    %c0_i32_0 = arith.constant 0 : i32
    %c0_i32_1 = arith.constant 0 : i32
    return %c0_i32, %c0_i32_0 : i32, i32
  }
  func.func @transform_7(%arg0: i32) -> (i32, i32) {
    %c0_i32 = arith.constant 0 : i32
    %c0_i32_0 = arith.constant 0 : i32
    return %arg0, %c0_i32 : i32, i32
  }
}

</mosaic_0001>

<bundles_post_ra>
// kernel: encoder_forward.1
= control target key start
LH: loop header
LB: loop body
LE: loop exit
PB: predicated region body
PF: predicated region fallthrough
CT: control target
= control target key end

     0   :  { %12 = vsyncpa [#allocation3], 0  ;;  %s4453_s0 = inlined_call_operand.vmem [shape: f32[8,256], index: 0, kind: input, shape index: {}]   ;;  %s4454_s1 = inlined_call_operand.hbm [shape: bf16[256,1024], index: 1, kind: input, shape index: {}]   ;;  %s4455_s2 = inlined_call_operand.vmem [shape: f32[1,1024], index: 2, kind: input, shape index: {}]   ;;  %s4456_s3 = inlined_call_operand.hbm [shape: bf16[1024,512], index: 3, kind: input, shape index: {}]   ;;  %s4457_s4 = inlined_call_operand.vmem [shape: f32[1,512], index: 4, kind: input, shape index: {}]   ;;  %s4458_s5 = inlined_call_operand.hbm [shape: bf16[512,128], index: 5, kind: input, shape index: {}]   ;;  %s4459_s6 = inlined_call_operand.vmem [shape: f32[1,128], index: 6, kind: input, shape index: {}]   ;;  %s4460_s7 = inlined_call_operand.vmem [shape: f32[8,128], index: 7, kind: output, shape index: {}]  }
   0x1   :  { %13 = vsyncpa [#allocation5], 0  ;;  %s4290_s24 = smov [#allocation4]   ;;  %s4220_s28 = scalar_lea.hbm %s4456_s3, 32768 }
   0x2   :  { %s35_s25 = sshll.u32 %s4290_s24, 4  ;;  %p4221_p0 = scmp.ne.s32.totalorder %s4456_s3, %s4220_s28  ;;  %s36_s25 = int_to_ptr.vmem [resolvable:$true] %s35_s25 }
   0x3   :  { %p4224_p1 = scmp.lt.u32.totalorder %s4220_s28, %s4456_s3 }
   0x5   :  { %p4226_p2 = pnand %p4224_p1, %p4221_p0 }
   0x7   :  { %4229 = shalt.err (!%p4226_p2)
}
   0x8   :  { %s4230_s10 = scalar_lea.vmem %s36_s25, 32768  ;;  %p4235_p4 = scmp.lt.s32.totalorder %s36_s25, %s36_s25 }
   0x9   :  { %p4231_p3 = scmp.ne.s32.totalorder %s36_s25, %s4230_s10  ;;  %p4236_p5 = scmp.lt.s32.totalorder %s4230_s10, %s4230_s10 }
   0xb   :  { %p4237_p6 = por %p4236_p5, %p4235_p4 }
   0xd   :  { %p4238_p7 = pnand %p4237_p6, %p4231_p3 }
   0xf   :  { %4241 = shalt.err (!%p4238_p7)
}
  0x10   :  { %s4291_s11 = smov 256   ;;  %s4292_s12 = smov 16  }
  0x11   :  { %41 = dma.hbm_to_vmem [thread:$0]  %s4456_s3, 32768, %s36_s25, [#allocation5], %s4291_s11, %s4291_s11, %s4292_s12  }
  0x12   :  { %s4293_s15 = smov [#allocation2]   ;;  %s4242_s19 = scalar_lea.hbm %s4454_s1, 16384 }
  0x13   :  { %s21_s16 = sshll.u32 %s4293_s15, 4  ;;  %p4243_p8 = scmp.ne.s32.totalorder %s4454_s1, %s4242_s19  ;;  %s22_s16 = int_to_ptr.vmem [resolvable:$true] %s21_s16 }
  0x14   :  { %p4246_p9 = scmp.lt.u32.totalorder %s4242_s19, %s4454_s1 }
  0x16   :  { %p4248_p10 = pnand %p4246_p9, %p4243_p8 }
  0x18   :  { %4251 = shalt.err (!%p4248_p10)
}
  0x19   :  { %s4252_s24 = scalar_lea.vmem %s22_s16, 16384  ;;  %p4257_p12 = scmp.lt.s32.totalorder %s22_s16, %s22_s16 }
  0x1a   :  { %p4253_p11 = scmp.ne.s32.totalorder %s22_s16, %s4252_s24  ;;  %p4258_p13 = scmp.lt.s32.totalorder %s4252_s24, %s4252_s24 }
  0x1c   :  { %p4259_p0 = por %p4258_p13, %p4257_p12 }
  0x1e   :  { %p4260_p1 = pnand %p4259_p0, %p4253_p11 }
  0x20   :  { %4263 = shalt.err (!%p4260_p1)
}
  0x21   :  { %s4294_s3 = smov 512   ;;  %s4295_s25 = smov 32  }
  0x22   :  { %27 = dma.hbm_to_vmem [thread:$0]  %s4454_s1, 16384, %s22_s16, [#allocation3], %s4294_s3, %s4294_s3, %s4295_s25  }
  0x23   :  { %s4296_s28 = smov [#allocation6]   ;;  %s4264_s9 = scalar_lea.hbm %s4458_s5, 4096 }
  0x24   :  { %s49_s29 = sshll.u32 %s4296_s28, 4  ;;  %p4265_p2 = scmp.ne.s32.totalorder %s4458_s5, %s4264_s9  ;;  %s50_s29 = int_to_ptr.vmem [resolvable:$true] %s49_s29 }
  0x25   :  { %p4268_p3 = scmp.lt.u32.totalorder %s4264_s9, %s4458_s5 }
  0x27   :  { %p4270_p4 = pnand %p4268_p3, %p4265_p2 }
  0x29   :  { %4273 = shalt.err (!%p4270_p4)
}
  0x2a   :  { %s4274_s14 = scalar_lea.vmem %s50_s29, 4096  ;;  %p4279_p6 = scmp.lt.s32.totalorder %s50_s29, %s50_s29 }
  0x2b   :  { %p4275_p5 = scmp.ne.s32.totalorder %s50_s29, %s4274_s14  ;;  %p4280_p7 = scmp.lt.s32.totalorder %s4274_s14, %s4274_s14 }
  0x2d   :  { %p4281_p8 = por %p4280_p7, %p4279_p6 }
  0x2f   :  { %p4282_p9 = pnand %p4281_p8, %p4275_p5 }
  0x31   :  { %4285 = shalt.err (!%p4282_p9)
}
  0x32   :  { %s4297_s1 = smov 64   ;;  %s4298_s15 = smov 4  }
  0x33   :  { %55 = dma.hbm_to_vmem [thread:$0]  %s4458_s5, 4096, %s50_s29, [#allocation5], %s4297_s1, %s4297_s1, %s4298_s15  }
  0x34   :  { %4286 = dma.done.wait [#allocation3], 16384  }
  0x35   :  { %4287 = vsyncadd [#allocation3], 4294950912 }
  0x36   :  { %4288 = dma.done.wait [#allocation5], 36864  }
  0x37   :  { %4289 = vsyncadd [#allocation5], 4294930432  ;;  %v72_v0 = vld [vmem:[#allocation2] sm:$0xff]  ;;  %v73_v17 = vld [vmem:[#allocation2 + $0x8] sm:$0xff] }
  0x38   :  { %v76_v1 = vld [vmem:[#allocation2 + $0x20] sm:$0xff]  ;;  %v77_v18 = vld [vmem:[#allocation2 + $0x28] sm:$0xff] }
  0x39   :  { %v80_v2 = vld [vmem:[#allocation2 + $0x40] sm:$0xff]  ;;  %v3307_v3 = vcombine.high %v72_v0, %v76_v1  ;;  %v3306_v4 = vcombine.low %v72_v0, %v76_v1  ;;  %v69_v19 = vld [vmem:[%s4453_s0 + $0x8] sm:$0xff]  ;;  %v3309_v21 = vcombine.high %v73_v17, %v77_v18  ;;  %v3308_v22 = vcombine.low %v73_v17, %v77_v18 }
  0x3a   :  { %v84_v5 = vld [vmem:[#allocation2 + $0x60] sm:$0xff]  ;;  %v4378_v23 = vpack.c.bf16 %v69_v19, %v69_v19  ;;  %v81_v24 = vld [vmem:[#allocation2 + $0x48] sm:$0xff] }
  0x3b   :  { %v3315_v6 = vcombine.high %v80_v2, %v84_v5  ;;  %v88_v7 = vld [vmem:[#allocation2 + $0x80] sm:$0xff]  ;;  %882 = vmatprep.subr.bf16.mxu0 %v3307_v3  ;;  %v3314_v9 = vcombine.low %v80_v2, %v84_v5  ;;  %v85_v25 = vld [vmem:[#allocation2 + $0x68] sm:$0xff]  ;;  %923 = vmatprep.subr.bf16.mxu1 %v3309_v21 }
  0x3c   :  { %v92_v8 = vld [vmem:[#allocation2 + $0xa0] sm:$0xff]  ;;  %883 = vmatpush1.bf16.msra.mxu0 %v3306_v4  ;;  %v3317_v27 = vcombine.high %v81_v24, %v85_v25  ;;  %v89_v28 = vld [vmem:[#allocation2 + $0x88] sm:$0xff]  ;;  %914 = vmatprep.mubr.bf16.mxu0 %v4378_v23  ;;  %v3316_v32 = vcombine.low %v81_v24, %v85_v25 }
  0x3d   :  { %884 = vmatprep.subr.bf16.mxu0 %v3315_v6  ;;  %v3323_v10 = vcombine.high %v88_v7, %v92_v8  ;;  %v96_v11 = vld [vmem:[#allocation2 + $0xc0] sm:$0xff]  ;;  %v3322_v13 = vcombine.low %v88_v7, %v92_v8  ;;  %v93_v29 = vld [vmem:[#allocation2 + $0xa8] sm:$0xff]  ;;  %924 = vmatpush1.bf16.msra.mxu1 %v3308_v22 }
  0x3e   :  { %v100_v12 = vld [vmem:[#allocation2 + $0xe0] sm:$0xff]  ;;  %955 = vmatprep.mubr.bf16.mxu1 %v4378_v23  ;;  %925 = vmatprep.subr.bf16.mxu1 %v3317_v27  ;;  %v3325_v34 = vcombine.high %v89_v28, %v93_v29  ;;  %v97_v36 = vld [vmem:[#allocation2 + $0xc8] sm:$0xff]  ;;  %v3324_v40 = vcombine.low %v89_v28, %v93_v29 }
  0x3f   :  { %v3331_v14 = vcombine.high %v96_v11, %v100_v12  ;;  %v104_v15 = vld [vmem:[#allocation2 + $0x100] sm:$0xff]  ;;  %v3330_v20 = vcombine.low %v96_v11, %v100_v12  ;;  %v101_v37 = vld [vmem:[#allocation2 + $0xe8] sm:$0xff] }
  0x40   :  { %885 = vmatpush1.bf16.msra.mxu0 %v3314_v9  ;;  %v108_v16 = vld [vmem:[#allocation2 + $0x120] sm:$0xff]  ;;  %v3333_v42 = vcombine.high %v97_v36, %v101_v37  ;;  %v105_v44 = vld [vmem:[#allocation2 + $0x108] sm:$0xff]  ;;  %v3332_v48 = vcombine.low %v97_v36, %v101_v37 }
  0x41   :  { %886 = vmatprep.subr.bf16.mxu0 %v3323_v10  ;;  %v3339_v26 = vcombine.high %v104_v15, %v108_v16  ;;  %v112_v30 = vld [vmem:[#allocation2 + $0x140] sm:$0xff]  ;;  %v3338_v33 = vcombine.low %v104_v15, %v108_v16  ;;  %926 = vmatpush1.bf16.msra.mxu1 %v3316_v32  ;;  %v109_v45 = vld [vmem:[#allocation2 + $0x128] sm:$0xff] }
  0x42   :  { %v116_v31 = vld [vmem:[#allocation2 + $0x160] sm:$0xff]  ;;  %927 = vmatprep.subr.bf16.mxu1 %v3325_v34  ;;  %v3341_v50 = vcombine.high %v105_v44, %v109_v45  ;;  %v113_v52 = vld [vmem:[#allocation2 + $0x148] sm:$0xff]  ;;  %v3340_v56 = vcombine.low %v105_v44, %v109_v45 }
  0x43   :  { %v3347_v35 = vcombine.high %v112_v30, %v116_v31  ;;  %v120_v38 = vld [vmem:[#allocation2 + $0x180] sm:$0xff]  ;;  %v3346_v41 = vcombine.low %v112_v30, %v116_v31  ;;  %v117_v53 = vld [vmem:[#allocation2 + $0x168] sm:$0xff] }
  0x44   :  { %887 = vmatpush1.bf16.msra.mxu0 %v3322_v13  ;;  %v124_v39 = vld [vmem:[#allocation2 + $0x1a0] sm:$0xff]  ;;  %v3349_v58 = vcombine.high %v113_v52, %v117_v53  ;;  %v121_v60 = vld [vmem:[#allocation2 + $0x188] sm:$0xff]  ;;  %v3348_v0 = vcombine.low %v113_v52, %v117_v53 }
  0x45   :  { %888 = vmatprep.subr.bf16.mxu0 %v3331_v14  ;;  %v3355_v43 = vcombine.high %v120_v38, %v124_v39  ;;  %v128_v46 = vld [vmem:[#allocation2 + $0x1c0] sm:$0xff]  ;;  %928 = vmatpush1.bf16.msra.mxu1 %v3324_v40  ;;  %v3354_v49 = vcombine.low %v120_v38, %v124_v39  ;;  %v125_v61 = vld [vmem:[#allocation2 + $0x1a8] sm:$0xff] }
  0x46   :  { %v132_v47 = vld [vmem:[#allocation2 + $0x1e0] sm:$0xff]  ;;  %929 = vmatprep.subr.bf16.mxu1 %v3333_v42  ;;  %v3357_v2 = vcombine.high %v121_v60, %v125_v61  ;;  %v129_v4 = vld [vmem:[#allocation2 + $0x1c8] sm:$0xff]  ;;  %v3356_v8 = vcombine.low %v121_v60, %v125_v61 }
  0x47   :  { %v3363_v51 = vcombine.high %v128_v46, %v132_v47  ;;  %v136_v54 = vld [vmem:[#allocation2 + $0x200] sm:$0xff]  ;;  %v3362_v57 = vcombine.low %v128_v46, %v132_v47  ;;  %v133_v5 = vld [vmem:[#allocation2 + $0x1e8] sm:$0xff] }
  0x48   :  { %889 = vmatpush1.bf16.msra.mxu0 %v3330_v20  ;;  %v140_v55 = vld [vmem:[#allocation2 + $0x220] sm:$0xff]  ;;  %v3365_v10 = vcombine.high %v129_v4, %v133_v5  ;;  %v137_v12 = vld [vmem:[#allocation2 + $0x208] sm:$0xff]  ;;  %v3364_v16 = vcombine.low %v129_v4, %v133_v5 }
  0x49   :  { %890 = vmatprep.subr.bf16.mxu0 %v3339_v26  ;;  %930 = vmatpush1.bf16.msra.mxu1 %v3332_v48  ;;  %v3371_v59 = vcombine.high %v136_v54, %v140_v55  ;;  %v144_v62 = vld [vmem:[#allocation2 + $0x240] sm:$0xff]  ;;  %v3370_v1 = vcombine.low %v136_v54, %v140_v55  ;;  %v141_v13 = vld [vmem:[#allocation2 + $0x228] sm:$0xff]  ;;  %v74_v55 = vld [vmem:[#allocation2 + $0x10] sm:$0xff] }
  0x4a   :  { %931 = vmatprep.subr.bf16.mxu1 %v3341_v50  ;;  %v148_v63 = vld [vmem:[#allocation2 + $0x260] sm:$0xff]  ;;  %v3373_v18 = vcombine.high %v137_v12, %v141_v13  ;;  %v145_v20 = vld [vmem:[#allocation2 + $0x248] sm:$0xff]  ;;  %v3372_v25 = vcombine.low %v137_v12, %v141_v13 }
  0x4b   :  { %v3379_v3 = vcombine.high %v144_v62, %v148_v63  ;;  %v152_v6 = vld [vmem:[#allocation2 + $0x280] sm:$0xff]  ;;  %v3378_v9 = vcombine.low %v144_v62, %v148_v63  ;;  %v149_v21 = vld [vmem:[#allocation2 + $0x268] sm:$0xff] }
  0x4c   :  { %891 = vmatpush1.bf16.msra.mxu0 %v3338_v33  ;;  %v156_v7 = vld [vmem:[#allocation2 + $0x2a0] sm:$0xff]  ;;  %v3381_v28 = vcombine.high %v145_v20, %v149_v21  ;;  %v153_v30 = vld [vmem:[#allocation2 + $0x288] sm:$0xff]  ;;  %v3380_v33 = vcombine.low %v145_v20, %v149_v21  ;;  %v106_v21 = vld [vmem:[#allocation2 + $0x110] sm:$0xff] }
  0x4d   :  { %892 = vmatprep.subr.bf16.mxu0 %v3347_v35  ;;  %932 = vmatpush1.bf16.msra.mxu1 %v3340_v56  ;;  %v3387_v11 = vcombine.high %v152_v6, %v156_v7  ;;  %v160_v14 = vld [vmem:[#allocation2 + $0x2c0] sm:$0xff]  ;;  %v3386_v17 = vcombine.low %v152_v6, %v156_v7  ;;  %v157_v31 = vld [vmem:[#allocation2 + $0x2a8] sm:$0xff]  ;;  %v78_v56 = vld [vmem:[#allocation2 + $0x30] sm:$0xff] }
  0x4e   :  { %933 = vmatprep.subr.bf16.mxu1 %v3349_v58  ;;  %v164_v15 = vld [vmem:[#allocation2 + $0x2e0] sm:$0xff]  ;;  %v3389_v36 = vcombine.high %v153_v30, %v157_v31  ;;  %v161_v38 = vld [vmem:[#allocation2 + $0x2c8] sm:$0xff]  ;;  %v3311_v63 = vcombine.high %v74_v55, %v78_v56  ;;  %v3310_v6 = vcombine.low %v74_v55, %v78_v56  ;;  %v138_v55 = vld [vmem:[#allocation2 + $0x210] sm:$0xff] }
  0x4f   :  { %v3395_v19 = vcombine.high %v160_v14, %v164_v15  ;;  %v168_v22 = vld [vmem:[#allocation2 + $0x300] sm:$0xff]  ;;  %v3394_v26 = vcombine.low %v160_v14, %v164_v15  ;;  %v165_v39 = vld [vmem:[#allocation2 + $0x2e8] sm:$0xff]  ;;  %v98_v14 = vld [vmem:[#allocation2 + $0xd0] sm:$0xff] }
  0x50   :  { %893 = vmatpush1.bf16.msra.mxu0 %v3346_v41  ;;  %v172_v24 = vld [vmem:[#allocation2 + $0x320] sm:$0xff]  ;;  %v3388_v41 = vcombine.low %v153_v30, %v157_v31  ;;  %v3397_v44 = vcombine.high %v161_v38, %v165_v39  ;;  %v169_v46 = vld [vmem:[#allocation2 + $0x308] sm:$0xff]  ;;  %v114_v30 = vld [vmem:[#allocation2 + $0x150] sm:$0xff] }
  0x51   :  { %894 = vmatprep.subr.bf16.mxu0 %v3355_v43  ;;  %934 = vmatpush1.bf16.msra.mxu1 %v3348_v0  ;;  %v176_v27 = vld [vmem:[#allocation2 + $0x340] sm:$0xff]  ;;  %v3403_v29 = vcombine.high %v168_v22, %v172_v24  ;;  %v3402_v34 = vcombine.low %v168_v22, %v172_v24  ;;  %v173_v47 = vld [vmem:[#allocation2 + $0x328] sm:$0xff]  ;;  %v82_v0 = vld [vmem:[#allocation2 + $0x50] sm:$0xff] }
  0x52   :  { %935 = vmatprep.subr.bf16.mxu1 %v3357_v2  ;;  %v180_v32 = vld [vmem:[#allocation2 + $0x360] sm:$0xff]  ;;  %v177_v52 = vld [vmem:[#allocation2 + $0x348] sm:$0xff]  ;;  %v142_v56 = vld [vmem:[#allocation2 + $0x230] sm:$0xff] }
  0x53   :  { %v184_v35 = vld [vmem:[#allocation2 + $0x380] sm:$0xff]  ;;  %v3411_v37 = vcombine.high %v176_v27, %v180_v32  ;;  %v3410_v42 = vcombine.low %v176_v27, %v180_v32  ;;  %v181_v54 = vld [vmem:[#allocation2 + $0x368] sm:$0xff]  ;;  %v110_v27 = vld [vmem:[#allocation2 + $0x130] sm:$0xff] }
  0x54   :  { %895 = vmatpush1.bf16.msra.mxu0 %v3354_v49  ;;  %v188_v40 = vld [vmem:[#allocation2 + $0x3a0] sm:$0xff]  ;;  %v3396_v49 = vcombine.low %v161_v38, %v165_v39  ;;  %v3413_v60 = vcombine.high %v177_v52, %v181_v54  ;;  %v185_v61 = vld [vmem:[#allocation2 + $0x388] sm:$0xff]  ;;  %v3343_v32 = vcombine.high %v106_v21, %v110_v27  ;;  %v122_v38 = vld [vmem:[#allocation2 + $0x190] sm:$0xff] }
  0x55   :  { %896 = vmatprep.subr.bf16.mxu0 %v3363_v51  ;;  %936 = vmatpush1.bf16.msra.mxu1 %v3356_v8  ;;  %v192_v43 = vld [vmem:[#allocation2 + $0x3c0] sm:$0xff]  ;;  %v3419_v45 = vcombine.high %v184_v35, %v188_v40  ;;  %v3418_v50 = vcombine.low %v184_v35, %v188_v40  ;;  %v3405_v51 = vcombine.high %v169_v46, %v173_v47  ;;  %v189_v62 = vld [vmem:[#allocation2 + $0x3a8] sm:$0xff]  ;;  %v118_v35 = vld [vmem:[#allocation2 + $0x170] sm:$0xff] }
  0x56   :  { %937 = vmatprep.subr.bf16.mxu1 %v3365_v10  ;;  %v196_v48 = vld [vmem:[#allocation2 + $0x3e0] sm:$0xff]  ;;  %v3421_v4 = vcombine.high %v185_v61, %v189_v62  ;;  %v193_v5 = vld [vmem:[#allocation2 + $0x3c8] sm:$0xff]  ;;  %v94_v10 = vld [vmem:[#allocation2 + $0xb0] sm:$0xff] }
  0x57   :  { %v3427_v53 = vcombine.high %v192_v43, %v196_v48  ;;  %v3426_v58 = vcombine.low %v192_v43, %v196_v48  ;;  %v197_v7 = vld [vmem:[#allocation2 + $0x3e8] sm:$0xff]  ;;  %v126_v39 = vld [vmem:[#allocation2 + $0x1b0] sm:$0xff]  ;;  %v3351_v43 = vcombine.high %v114_v30, %v118_v35 }
  0x58   :  { %897 = vmatpush1.bf16.msra.mxu0 %v3362_v57  ;;  %v3404_v57 = vcombine.low %v169_v46, %v173_v47  ;;  %v3429_v12 = vcombine.high %v193_v5, %v197_v7  ;;  %v111_v46 = vld [vmem:[#allocation2 + $0x138] sm:$0xff]  ;;  %v3350_v47 = vcombine.low %v114_v30, %v118_v35  ;;  %v130_v48 = vld [vmem:[#allocation2 + $0x1d0] sm:$0xff] }
  0x59   :  { %898 = vmatprep.subr.bf16.mxu0 %v3371_v59  ;;  %938 = vmatpush1.bf16.msra.mxu1 %v3364_v16  ;;  %v68_v59 = vld [vmem:[%s4453_s0] sm:$0xff]  ;;  %v75_v16 = vld [vmem:[#allocation2 + $0x18] sm:$0xff] }
  0x5a   :  { %939 = vmatprep.subr.bf16.mxu1 %v3373_v18  ;;  %v4385_v2 = vpack.c.bf16 %v68_v59, %v68_v59  ;;  %v102_v18 = vld [vmem:[#allocation2 + $0xf0] sm:$0xff]  ;;  %v155_v30 = vld [vmem:[#allocation2 + $0x298] sm:$0xff] }
  0x5b   :  { %v3335_v24 = vcombine.high %v98_v14, %v102_v18 }
  0x5c   :  { %899 = vmatpush1.bf16.msra.mxu0 %v3370_v1  ;;  %v86_v1 = vld [vmem:[#allocation2 + $0x70] sm:$0xff] }
  0x5d   :  { %900 = vmatprep.subr.bf16.mxu0 %v3379_v3  ;;  %940 = vmatpush1.bf16.msra.mxu1 %v3372_v25  ;;  %v3412_v3 = vcombine.low %v177_v52, %v181_v54  ;;  %v3319_v8 = vcombine.high %v82_v0, %v86_v1  ;;  %v3318_v13 = vcombine.low %v82_v0, %v86_v1  ;;  %v83_v25 = vld [vmem:[#allocation2 + $0x58] sm:$0xff]  ;;  %v150_v0 = vld [vmem:[#allocation2 + $0x270] sm:$0xff] }
  0x5e   :  { %941 = vmatprep.subr.bf16.mxu1 %v3381_v28  ;;  %v115_v52 = vld [vmem:[#allocation2 + $0x158] sm:$0xff]  ;;  %v3358_v54 = vcombine.low %v122_v38, %v126_v39 }
  0x60   :  { %901 = vmatpush1.bf16.msra.mxu0 %v3378_v9  ;;  %v90_v9 = vld [vmem:[#allocation2 + $0x90] sm:$0xff] }
  0x61   :  { %902 = vmatprep.subr.bf16.mxu0 %v3387_v11  ;;  %942 = vmatpush1.bf16.msra.mxu1 %v3380_v33  ;;  %v3420_v11 = vcombine.low %v185_v61, %v189_v62  ;;  %v3327_v15 = vcombine.high %v90_v9, %v94_v10  ;;  %v3326_v20 = vcombine.low %v90_v9, %v94_v10  ;;  %v91_v33 = vld [vmem:[#allocation2 + $0x98] sm:$0xff]  ;;  %v158_v9 = vld [vmem:[#allocation2 + $0x2b0] sm:$0xff] }
  0x62   :  { %943 = vmatprep.subr.bf16.mxu1 %v3389_v36  ;;  %v127_v61 = vld [vmem:[#allocation2 + $0x1b8] sm:$0xff] }
  0x64   :  { %903 = vmatpush1.bf16.msra.mxu0 %v3386_v17  ;;  %v79_v17 = vld [vmem:[#allocation2 + $0x38] sm:$0xff] }
  0x65   :  { %904 = vmatprep.subr.bf16.mxu0 %v3395_v19  ;;  %944 = vmatpush1.bf16.msra.mxu1 %v3388_v41  ;;  %v3428_v19 = vcombine.low %v193_v5, %v197_v7  ;;  %v3313_v22 = vcombine.high %v75_v16, %v79_v17  ;;  %v3312_v28 = vcombine.low %v75_v16, %v79_v17  ;;  %v99_v41 = vld [vmem:[#allocation2 + $0xd8] sm:$0xff]  ;;  %v162_v16 = vld [vmem:[#allocation2 + $0x2d0] sm:$0xff] }
  0x66   :  { %945 = vmatprep.subr.bf16.mxu1 %v3397_v44  ;;  %v131_v5 = vld [vmem:[#allocation2 + $0x1d8] sm:$0xff]  ;;  %v3374_v7 = vcombine.low %v138_v55, %v142_v56  ;;  %v166_v17 = vld [vmem:[#allocation2 + $0x2f0] sm:$0xff] }
  0x68   :  { %905 = vmatpush1.bf16.msra.mxu0 %v3394_v26  ;;  %v87_v26 = vld [vmem:[#allocation2 + $0x78] sm:$0xff] }
  0x69   :  { %906 = vmatprep.subr.bf16.mxu0 %v3403_v29  ;;  %946 = vmatpush1.bf16.msra.mxu1 %v3396_v49  ;;  %v3334_v29 = vcombine.low %v98_v14, %v102_v18  ;;  %v3321_v31 = vcombine.high %v83_v25, %v87_v26  ;;  %v3320_v36 = vcombine.low %v83_v25, %v87_v26  ;;  %v134_v49 = vld [vmem:[#allocation2 + $0x1f0] sm:$0xff]  ;;  %v143_v14 = vld [vmem:[#allocation2 + $0x238] sm:$0xff] }
  0x6a   :  { %947 = vmatprep.subr.bf16.mxu1 %v3405_v51  ;;  %v3366_v62 = vcombine.low %v130_v48, %v134_v49  ;;  %v170_v25 = vld [vmem:[#allocation2 + $0x310] sm:$0xff] }
  0x6b   :  { %v174_v26 = vld [vmem:[#allocation2 + $0x330] sm:$0xff] }
  0x6c   :  { %907 = vmatpush1.bf16.msra.mxu0 %v3402_v34  ;;  %v95_v34 = vld [vmem:[#allocation2 + $0xb8] sm:$0xff] }
  0x6d   :  { %908 = vmatprep.subr.bf16.mxu0 %v3411_v37  ;;  %948 = vmatpush1.bf16.msra.mxu1 %v3404_v57  ;;  %v3342_v37 = vcombine.low %v106_v21, %v110_v27  ;;  %v3329_v40 = vcombine.high %v91_v33, %v95_v34  ;;  %v3328_v44 = vcombine.low %v91_v33, %v95_v34  ;;  %v147_v21 = vld [vmem:[#allocation2 + $0x258] sm:$0xff]  ;;  %v178_v33 = vld [vmem:[#allocation2 + $0x350] sm:$0xff] }
  0x6e   :  { %949 = vmatprep.subr.bf16.mxu1 %v3413_v60  ;;  %v123_v60 = vld [vmem:[#allocation2 + $0x198] sm:$0xff]  ;;  %v182_v34 = vld [vmem:[#allocation2 + $0x370] sm:$0xff] }
  0x6f   :  { %v3361_v10 = vcombine.high %v123_v60, %v127_v61 }
  0x70   :  { %909 = vmatpush1.bf16.msra.mxu0 %v3410_v42  ;;  %v103_v42 = vld [vmem:[#allocation2 + $0xf8] sm:$0xff] }
  0x71   :  { %910 = vmatprep.subr.bf16.mxu0 %v3419_v45  ;;  %950 = vmatpush1.bf16.msra.mxu1 %v3412_v3  ;;  %v107_v45 = vld [vmem:[#allocation2 + $0x118] sm:$0xff]  ;;  %v3336_v51 = vcombine.low %v99_v41, %v103_v42  ;;  %v3375_v3 = vcombine.high %v138_v55, %v142_v56 }
  0x72   :  { %951 = vmatprep.subr.bf16.mxu1 %v3421_v4  ;;  %v3345_v57 = vcombine.high %v107_v45, %v111_v46  ;;  %v3344_v59 = vcombine.low %v107_v45, %v111_v46  ;;  %v171_v46 = vld [vmem:[#allocation2 + $0x318] sm:$0xff] }
  0x74   :  { %911 = vmatpush1.bf16.msra.mxu0 %v3418_v50  ;;  %v3359_v50 = vcombine.high %v122_v38, %v126_v39  ;;  %v163_v38 = vld [vmem:[#allocation2 + $0x2d8] sm:$0xff] }
  0x75   :  { %912 = vmatprep.subr.bf16.mxu0 %v3427_v53  ;;  %952 = vmatpush1.bf16.msra.mxu1 %v3420_v11  ;;  %v119_v53 = vld [vmem:[#allocation2 + $0x178] sm:$0xff] }
  0x76   :  { %953 = vmatprep.subr.bf16.mxu1 %v3429_v12  ;;  %v3353_v1 = vcombine.high %v115_v52, %v119_v53  ;;  %v3352_v4 = vcombine.low %v115_v52, %v119_v53  ;;  %v3360_v12 = vcombine.low %v123_v60, %v127_v61  ;;  %v167_v39 = vld [vmem:[#allocation2 + $0x2f8] sm:$0xff]  ;;  %v3806_v61 = vld [vmem:[#allocation4 + $0x4] ss:$16 sps:$4 sm:$0xff]  }
  0x77   :  { %v3400_v52 = vcombine.low %v163_v38, %v167_v39  ;;  %v179_v53 = vld [vmem:[#allocation2 + $0x358] sm:$0xff] }
  0x78   :  { %913 = vmatpush1.bf16.msra.mxu0 %v3426_v58  ;;  %v3367_v58 = vcombine.high %v130_v48, %v134_v49  ;;  %v3414_v48 = vcombine.low %v178_v33, %v182_v34  ;;  %v194_v49 = vld [vmem:[#allocation2 + $0x3d0] sm:$0xff]  ;;  %v191_v60 = vld [vmem:[#allocation2 + $0x3b8] sm:$0xff] }
  0x79   :  { %964 = vmatprep.subr.bf16.mxu0 %v3311_v63  ;;  %954 = vmatpush1.bf16.msra.mxu1 %v3428_v19  ;;  %v146_v63 = vld [vmem:[#allocation2 + $0x250] sm:$0xff] }
  0x7a   :  { %1005 = vmatprep.subr.bf16.mxu1 %v3313_v22  ;;  %v3383_v11 = vcombine.high %v146_v63, %v150_v0  ;;  %v151_v22 = vld [vmem:[#allocation2 + $0x278] sm:$0xff] }
  0x7b   :  { %915 = vmatmul.mubr.bf16.vlgmr.msra.gmra.mrb[0].mxu0 %v4385_v2  ;;  %v3385_v35 = vcombine.high %v147_v21, %v151_v22 }
  0x7c   :  { %965 = vmatpush1.bf16.msra.mxu0 %v3310_v6  ;;  %996 = vmatprep.mubr.bf16.mxu0 %v4378_v23  ;;  %v135_v6 = vld [vmem:[#allocation2 + $0x1f8] sm:$0xff] }
  0x7d   :  { %966 = vmatprep.subr.bf16.mxu0 %v3319_v8  ;;  %956 = vmatmul.mubr.bf16.vlgmr.msra.gmra.mrb[0].mxu1 %v4385_v2  ;;  %v154_v8 = vld [vmem:[#allocation2 + $0x290] sm:$0xff]  ;;  %v3369_v18 = vcombine.high %v131_v5, %v135_v6 }
  0x7e   :  { %1006 = vmatpush1.bf16.msra.mxu1 %v3312_v28  ;;  %1037 = vmatprep.mubr.bf16.mxu1 %v4378_v23  ;;  %v3337_v23 = vcombine.high %v99_v41, %v103_v42  ;;  %v3391_v19 = vcombine.high %v154_v8, %v158_v9  ;;  %v3399_v28 = vcombine.high %v162_v16, %v166_v17  ;;  %v186_v41 = vld [vmem:[#allocation2 + $0x390] sm:$0xff] }
  0x7f   :  { %1007 = vmatprep.subr.bf16.mxu1 %v3321_v31  ;;  %v159_v31 = vld [vmem:[#allocation2 + $0x2b8] sm:$0xff]  ;;  %v190_v42 = vld [vmem:[#allocation2 + $0x3b0] sm:$0xff] }
  0x80   :  { %967 = vmatpush1.bf16.msra.mxu0 %v3318_v13  ;;  %v139_v13 = vld [vmem:[#allocation2 + $0x218] sm:$0xff]  ;;  %v3392_v45 = vcombine.low %v155_v30, %v159_v31  ;;  %v3422_v55 = vcombine.low %v186_v41, %v190_v42 }
  0x81   :  { %968 = vmatprep.subr.bf16.mxu0 %v3327_v15  ;;  %v3382_v15 = vcombine.low %v146_v63, %v150_v0  ;;  %v3377_v27 = vcombine.high %v139_v13, %v143_v14  ;;  %v3804_v0 = vld [vmem:[#allocation4] ss:$16 sps:$4 sm:$0xff]  }
  0x82   :  { %1008 = vmatpush1.bf16.msra.mxu1 %v3320_v36  ;;  %v3407_v36 = vcombine.high %v170_v25, %v174_v26 }
  0x83   :  { %1009 = vmatprep.subr.bf16.mxu1 %v3329_v40  ;;  %v3406_v40 = vcombine.low %v170_v25, %v174_v26  ;;  %v3827_v25 = vld [vmem:[#allocation4 + $0x6c] ss:$16 sps:$4 sm:$0xff]   ;;  %v3834_v26 = vld [vmem:[#allocation4 + $0xa0] ss:$16 sps:$4 sm:$0xff]  }
  0x84   :  { %969 = vmatpush1.bf16.msra.mxu0 %v3326_v20  ;;  %v3368_v20 = vcombine.low %v131_v5, %v135_v6  ;;  %v3812_v5 = vld [vmem:[#allocation4 + $0x24] ss:$16 sps:$4 sm:$0xff]  }
  0x85   :  { %970 = vmatprep.subr.bf16.mxu0 %v3335_v24  ;;  %v3390_v24 = vcombine.low %v154_v8, %v158_v9  ;;  %v3818_v9 = vld [vmem:[#allocation4 + $0x44] ss:$16 sps:$4 sm:$0xff]  }
  0x86   :  { %1010 = vmatpush1.bf16.msra.mxu1 %v3328_v44  ;;  %v3415_v44 = vcombine.high %v178_v33, %v182_v34  ;;  %v3846_v33 = vld [vmem:[#allocation4 + $0xe0] ss:$16 sps:$4 sm:$0xff]   ;;  %v3837_v34 = vld [vmem:[#allocation4 + $0xa8] ss:$16 sps:$4 sm:$0xff]  }
  0x87   :  { %1011 = vmatprep.subr.bf16.mxu1 %v3337_v23  ;;  %v198_v23 = vld [vmem:[#allocation2 + $0x3f0] sm:$0xff] }
  0x88   :  { %971 = vmatpush1.bf16.msra.mxu0 %v3334_v29  ;;  %v3376_v29 = vcombine.low %v139_v13, %v143_v14  ;;  %v3824_v14 = vld [vmem:[#allocation4 + $0x64] ss:$16 sps:$4 sm:$0xff]  }
  0x89   :  { %972 = vmatprep.subr.bf16.mxu0 %v3343_v32  ;;  %v3398_v32 = vcombine.low %v162_v16, %v166_v17  ;;  %v3815_v16 = vld [vmem:[#allocation4 + $0x2c] ss:$16 sps:$4 sm:$0xff]   ;;  %v3822_v17 = vld [vmem:[#allocation4 + $0x60] ss:$16 sps:$4 sm:$0xff]  }
  0x8a   :  { %1012 = vmatpush1.bf16.msra.mxu1 %v3336_v51  ;;  %v3423_v51 = vcombine.high %v186_v41, %v190_v42  ;;  %v3858_v41 = vld [vmem:[#allocation4 + $0x120] ss:$16 sps:$4 sm:$0xff]   ;;  %v3849_v42 = vld [vmem:[#allocation4 + $0xe8] ss:$16 sps:$4 sm:$0xff]  }
  0x8b   :  { %1013 = vmatprep.subr.bf16.mxu1 %v3345_v57  ;;  %v3431_v57 = vcombine.high %v194_v49, %v198_v23 }
  0x8c   :  { %973 = vmatpush1.bf16.msra.mxu0 %v3342_v37  ;;  %v3384_v37 = vcombine.low %v147_v21, %v151_v22  ;;  %v3828_v21 = vld [vmem:[#allocation4 + $0x80] ss:$16 sps:$4 sm:$0xff]   ;;  %v3836_v22 = vld [vmem:[#allocation4 + $0xa4] ss:$16 sps:$4 sm:$0xff]  }
  0x8d   :  { %974 = vmatprep.subr.bf16.mxu0 %v3351_v43  ;;  %v3393_v43 = vcombine.high %v155_v30, %v159_v31  ;;  %v3831_v30 = vld [vmem:[#allocation4 + $0x88] ss:$16 sps:$4 sm:$0xff]   ;;  %v3848_v31 = vld [vmem:[#allocation4 + $0xe4] ss:$16 sps:$4 sm:$0xff]  }
  0x8e   :  { %1014 = vmatpush1.bf16.msra.mxu1 %v3344_v59  ;;  %v187_v59 = vld [vmem:[#allocation2 + $0x398] sm:$0xff] }
  0x8f   :  { %1015 = vmatprep.subr.bf16.mxu1 %v3353_v1  ;;  %v3425_v6 = vcombine.high %v187_v59, %v191_v60  ;;  %v3424_v8 = vcombine.low %v187_v59, %v191_v60  ;;  %v3881_v59 = vld [vmem:[#allocation4 + $0x18c] ss:$16 sps:$4 sm:$0xff]   ;;  %v3888_v60 = vld [vmem:[#allocation4 + $0x1c0] ss:$16 sps:$4 sm:$0xff]  }
  0x90   :  { %975 = vmatpush1.bf16.msra.mxu0 %v3350_v47  ;;  %v175_v47 = vld [vmem:[#allocation2 + $0x338] sm:$0xff] }
  0x91   :  { %976 = vmatprep.subr.bf16.mxu0 %v3359_v50  ;;  %v3401_v50 = vcombine.high %v163_v38, %v167_v39  ;;  %v3409_v56 = vcombine.high %v171_v46, %v175_v47  ;;  %v3843_v38 = vld [vmem:[#allocation4 + $0xc8] ss:$16 sps:$4 sm:$0xff]   ;;  %v3860_v39 = vld [vmem:[#allocation4 + $0x124] ss:$16 sps:$4 sm:$0xff]  }
  0x92   :  { %1016 = vmatpush1.bf16.msra.mxu1 %v3352_v4  ;;  %v199_v4 = vld [vmem:[#allocation2 + $0x3f8] sm:$0xff] }
  0x93   :  { %1017 = vmatprep.subr.bf16.mxu1 %v3361_v10 }
  0x94   :  { %977 = vmatpush1.bf16.msra.mxu0 %v3358_v54  ;;  %v183_v54 = vld [vmem:[#allocation2 + $0x378] sm:$0xff] }
  0x95   :  { %978 = vmatprep.subr.bf16.mxu0 %v3367_v58  ;;  %v3408_v58 = vcombine.low %v171_v46, %v175_v47  ;;  %v3417_v63 = vcombine.high %v179_v53, %v183_v54  ;;  %v3416_v1 = vcombine.low %v179_v53, %v183_v54  ;;  %v3855_v46 = vld [vmem:[#allocation4 + $0x108] ss:$16 sps:$4 sm:$0xff]   ;;  %v3872_v47 = vld [vmem:[#allocation4 + $0x164] ss:$16 sps:$4 sm:$0xff]  }
  0x96   :  { %1018 = vmatpush1.bf16.msra.mxu1 %v3360_v12  ;;  %v3816_v12 = vld [vmem:[#allocation4 + $0x40] ss:$16 sps:$4 sm:$0xff]   ;;  %v3867_v53 = vld [vmem:[#allocation4 + $0x148] ss:$16 sps:$4 sm:$0xff]   ;;  %v3884_v54 = vld [vmem:[#allocation4 + $0x1a4] ss:$16 sps:$4 sm:$0xff]  }
  0x97   :  { %1019 = vmatprep.subr.bf16.mxu1 %v3369_v18  ;;  %v3830_v18 = vld [vmem:[#allocation4 + $0x84] ss:$16 sps:$4 sm:$0xff]  }
  0x98   :  { %979 = vmatpush1.bf16.msra.mxu0 %v3366_v62  ;;  %v3430_v62 = vcombine.low %v194_v49, %v198_v23  ;;  %v3870_v49 = vld [vmem:[#allocation4 + $0x160] ss:$16 sps:$4 sm:$0xff]   ;;  %v3861_v23 = vld [vmem:[#allocation4 + $0x128] ss:$16 sps:$4 sm:$0xff]  }
  0x99   :  { %980 = vmatprep.subr.bf16.mxu0 %v3375_v3  ;;  %v195_v3 = vld [vmem:[#allocation2 + $0x3d8] sm:$0xff] }
  0x9a   :  { %1020 = vmatpush1.bf16.msra.mxu1 %v3368_v20  ;;  %v3433_v10 = vcombine.high %v195_v3, %v199_v4  ;;  %v3432_v13 = vcombine.low %v195_v3, %v199_v4  ;;  %v3821_v20 = vld [vmem:[#allocation4 + $0x4c] ss:$16 sps:$4 sm:$0xff]   ;;  %v3885_v3 = vld [vmem:[#allocation4 + $0x1a8] ss:$16 sps:$4 sm:$0xff]  }
  0x9b   :  { %1021 = vmatprep.subr.bf16.mxu1 %v3377_v27  ;;  %v3825_v27 = vld [vmem:[#allocation4 + $0x68] ss:$16 sps:$4 sm:$0xff]   ;;  %v3893_v4 = vld [vmem:[#allocation4 + $0x1cc] ss:$16 sps:$4 sm:$0xff]  }
  0x9c   :  { %981 = vmatpush1.bf16.msra.mxu0 %v3374_v7  ;;  %v3810_v7 = vld [vmem:[#allocation4 + $0x20] ss:$16 sps:$4 sm:$0xff]  }
  0x9d   :  { %982 = vmatprep.subr.bf16.mxu0 %v3383_v11  ;;  %v3809_v11 = vld [vmem:[#allocation4 + $0xc] ss:$16 sps:$4 sm:$0xff]  }
  0x9e   :  { %1022 = vmatpush1.bf16.msra.mxu1 %v3376_v29  ;;  %v3833_v29 = vld [vmem:[#allocation4 + $0x8c] ss:$16 sps:$4 sm:$0xff]  }
  0x9f   :  { %1023 = vmatprep.subr.bf16.mxu1 %v3385_v35  ;;  %v3854_v35 = vld [vmem:[#allocation4 + $0x104] ss:$16 sps:$4 sm:$0xff]  }
  0xa0   :  { %983 = vmatpush1.bf16.msra.mxu0 %v3382_v15  ;;  %v3807_v15 = vld [vmem:[#allocation4 + $0x8] ss:$16 sps:$4 sm:$0xff]  }
  0xa1   :  { %984 = vmatprep.subr.bf16.mxu0 %v3391_v19  ;;  %v3813_v19 = vld [vmem:[#allocation4 + $0x28] ss:$16 sps:$4 sm:$0xff]  }
  0xa2   :  { %1024 = vmatpush1.bf16.msra.mxu1 %v3384_v37  ;;  %v3852_v37 = vld [vmem:[#allocation4 + $0x100] ss:$16 sps:$4 sm:$0xff]  }
  0xa3   :  { %1025 = vmatprep.subr.bf16.mxu1 %v3393_v43  ;;  %v3866_v43 = vld [vmem:[#allocation4 + $0x144] ss:$16 sps:$4 sm:$0xff]  }
  0xa4   :  { %985 = vmatpush1.bf16.msra.mxu0 %v3390_v24  ;;  %v3819_v24 = vld [vmem:[#allocation4 + $0x48] ss:$16 sps:$4 sm:$0xff]  }
  0xa5   :  { %986 = vmatprep.subr.bf16.mxu0 %v3399_v28  ;;  %v3842_v28 = vld [vmem:[#allocation4 + $0xc4] ss:$16 sps:$4 sm:$0xff]  }
  0xa6   :  { %1026 = vmatpush1.bf16.msra.mxu1 %v3392_v45  ;;  %v3864_v45 = vld [vmem:[#allocation4 + $0x140] ss:$16 sps:$4 sm:$0xff]  }
  0xa7   :  { %1027 = vmatprep.subr.bf16.mxu1 %v3401_v50  ;;  %v3878_v50 = vld [vmem:[#allocation4 + $0x184] ss:$16 sps:$4 sm:$0xff]  }
  0xa8   :  { %987 = vmatpush1.bf16.msra.mxu0 %v3398_v32  ;;  %v3839_v32 = vld [vmem:[#allocation4 + $0xac] ss:$16 sps:$4 sm:$0xff]  }
  0xa9   :  { %988 = vmatprep.subr.bf16.mxu0 %v3407_v36  ;;  %v3845_v36 = vld [vmem:[#allocation4 + $0xcc] ss:$16 sps:$4 sm:$0xff]  }
  0xaa   :  { %1028 = vmatpush1.bf16.msra.mxu1 %v3400_v52  ;;  %v3876_v52 = vld [vmem:[#allocation4 + $0x180] ss:$16 sps:$4 sm:$0xff]  }
  0xab   :  { %1029 = vmatprep.subr.bf16.mxu1 %v3409_v56  ;;  %v3882_v56 = vld [vmem:[#allocation4 + $0x1a0] ss:$16 sps:$4 sm:$0xff]  }
  0xac   :  { %989 = vmatpush1.bf16.msra.mxu0 %v3406_v40  ;;  %v3851_v40 = vld [vmem:[#allocation4 + $0xec] ss:$16 sps:$4 sm:$0xff]  }
  0xad   :  { %990 = vmatprep.subr.bf16.mxu0 %v3415_v44  ;;  %v3857_v44 = vld [vmem:[#allocation4 + $0x10c] ss:$16 sps:$4 sm:$0xff]  }
  0xae   :  { %1030 = vmatpush1.bf16.msra.mxu1 %v3408_v58  ;;  %v3873_v58 = vld [vmem:[#allocation4 + $0x168] ss:$16 sps:$4 sm:$0xff]  }
  0xaf   :  { %1031 = vmatprep.subr.bf16.mxu1 %v3417_v63  ;;  %v3887_v63 = vld [vmem:[#allocation4 + $0x1ac] ss:$16 sps:$4 sm:$0xff]  }
  0xb0   :  { %991 = vmatpush1.bf16.msra.mxu0 %v3414_v48  ;;  %v3863_v48 = vld [vmem:[#allocation4 + $0x12c] ss:$16 sps:$4 sm:$0xff]  }
  0xb1   :  { %992 = vmatprep.subr.bf16.mxu0 %v3423_v51  ;;  %v3869_v51 = vld [vmem:[#allocation4 + $0x14c] ss:$16 sps:$4 sm:$0xff]  }
  0xb2   :  { %1032 = vmatpush1.bf16.msra.mxu1 %v3416_v1  ;;  %v3902_v1 = vld [vmem:[#allocation4 + $0x204] ss:$16 sps:$4 sm:$0xff]  }
  0xb3   :  { %1033 = vmatprep.subr.bf16.mxu1 %v3425_v6  ;;  %v3899_v6 = vld [vmem:[#allocation4 + $0x1ec] ss:$16 sps:$4 sm:$0xff]  }
  0xb4   :  { %993 = vmatpush1.bf16.msra.mxu0 %v3422_v55  ;;  %v3875_v55 = vld [vmem:[#allocation4 + $0x16c] ss:$16 sps:$4 sm:$0xff]  }
  0xb5   :  { %994 = vmatprep.subr.bf16.mxu0 %v3431_v57  ;;  %v3890_v57 = vld [vmem:[#allocation4 + $0x1c4] ss:$16 sps:$4 sm:$0xff]  }
  0xb6   :  { %1034 = vmatpush1.bf16.msra.mxu1 %v3424_v8  ;;  %v3905_v8 = vld [vmem:[#allocation4 + $0x20c] ss:$16 sps:$4 sm:$0xff]  }
  0xb7   :  { %1035 = vmatprep.subr.bf16.mxu1 %v3433_v10 }
  0xb8   :  { %995 = vmatpush1.bf16.msra.mxu0 %v3430_v62  ;;  %v3879_v62 = vld [vmem:[#allocation4 + $0x188] ss:$16 sps:$4 sm:$0xff]  }
  0xb9   :  { %2620 = vmatprep.subr.bf16.mxu0 %v3806_v61  ;;  %v3896_v61 = vld [vmem:[#allocation4 + $0x1e4] ss:$16 sps:$4 sm:$0xff]  }
  0xba   :  { %1036 = vmatpush1.bf16.msra.mxu1 %v3432_v13 }
  0xbb   :  { %997 = vmatmul.mubr.bf16.vlgmr.msra.gmra.mrb[4].mxu0 %v4385_v2  ;;  %2784 = vmatprep.subr.bf16.mxu1 %v3809_v11 }
  0xbc   :  { %2621 = vmatpush1.bf16.msra.mxu0 %v3804_v0  ;;  %v3894_v0 = vld [vmem:[#allocation4 + $0x1e0] ss:$16 sps:$4 sm:$0xff]  }
  0xbd   :  { %2622 = vmatprep.subr.bf16.mxu0 %v3812_v5  ;;  %1038 = vmatmul.mubr.bf16.vlgmr.msra.gmra.mrb[4].mxu1 %v4385_v2  ;;  %v3840_v2 = vld [vmem:[#allocation4 + $0xc0] ss:$16 sps:$4 sm:$0xff]   ;;  %v3891_v5 = vld [vmem:[#allocation4 + $0x1c8] ss:$16 sps:$4 sm:$0xff]  }
  0xbe   :  { %2785 = vmatpush1.bf16.msra.mxu1 %v3807_v15 }
  0xbf   :  { %2786 = vmatprep.subr.bf16.mxu1 %v3815_v16 }
  0xc0   :  { %2623 = vmatpush1.bf16.msra.mxu0 %v3810_v7  ;;  %v3897_v7 = vld [vmem:[#allocation4 + $0x1e8] ss:$16 sps:$4 sm:$0xff]  }
  0xc1   :  { %2624 = vmatprep.subr.bf16.mxu0 %v3818_v9  ;;  %v202_v9 = vlaneseq }
  0xc2   :  { %2787 = vmatpush1.bf16.msra.mxu1 %v3813_v19 }
  0xc3   :  { %2788 = vmatprep.subr.bf16.mxu1 %v3821_v20  ;;  %v4393_v10 = vshrl.u32 %v202_v9, 7  ;;  %v3962_v9 = vld [vmem:[#allocation4 + $0x344] ss:$16 sps:$4 sm:$0xff]  }
  0xc4   :  { %2625 = vmatpush1.bf16.msra.mxu0 %v3816_v12  ;;  %v4399_v12 = vld [vmem:[%s4455_s2] sm:$0xff] }
  0xc5   :  { %2626 = vmatprep.subr.bf16.mxu0 %v3824_v14  ;;  %v204_v11 = vsub.s32 0, %v4393_v10  ;;  %v208_v13 = vsub.s32 1, %v4393_v10 }
  0xc6   :  { %2789 = vmatpush1.bf16.msra.mxu1 %v3819_v24 }
  0xc7   :  { %2790 = vmatprep.subr.bf16.mxu1 %v3827_v25  ;;  %v205_v14 = vrot.slane %v4399_v12, %v204_v11  ;;  %v209_v15 = vrot.slane %v4399_v12, %v208_v13  ;;  %v216_v25 = vsub.s32 3, %v4393_v10 }
  0xc8   :  { %2627 = vmatpush1.bf16.msra.mxu0 %v3822_v17 }
  0xc9   :  { %2628 = vmatprep.subr.bf16.mxu0 %v3830_v18 }
  0xca   :  { %2791 = vmatpush1.bf16.msra.mxu1 %v3825_v27  ;;  %v3900_v27 = vld [vmem:[#allocation4 + $0x200] ss:$16 sps:$4 sm:$0xff]  }
  0xcb   :  { %2792 = vmatprep.subr.bf16.mxu1 %v3833_v29 }
  0xcc   :  { %2629 = vmatpush1.bf16.msra.mxu0 %v3828_v21 }
  0xcd   :  { %2630 = vmatprep.subr.bf16.mxu0 %v3836_v22 }
  0xce   :  { %2793 = vmatpush1.bf16.msra.mxu1 %v3831_v30  ;;  %v3911_v30 = vld [vmem:[#allocation4 + $0x22c] ss:$16 sps:$4 sm:$0xff]  }
  0xcf   :  { %2794 = vmatprep.subr.bf16.mxu1 %v3839_v32  ;;  %v3906_v32 = vld [vmem:[#allocation4 + $0x220] ss:$16 sps:$4 sm:$0xff]  }
  0xd0   :  { %2631 = vmatpush1.bf16.msra.mxu0 %v3834_v26 }
  0xd1   :  { %2632 = vmatprep.subr.bf16.mxu0 %v3842_v28  ;;  %v3903_v28 = vld [vmem:[#allocation4 + $0x208] ss:$16 sps:$4 sm:$0xff]  }
  0xd2   :  { %2795 = vmatpush1.bf16.msra.mxu1 %v3837_v34  ;;  %v3914_v34 = vld [vmem:[#allocation4 + $0x244] ss:$16 sps:$4 sm:$0xff]  }
  0xd3   :  { %2796 = vmatprep.subr.bf16.mxu1 %v3845_v36 }
  0xd4   :  { %2633 = vmatpush1.bf16.msra.mxu0 %v3840_v2  ;;  %v3908_v2 = vld [vmem:[#allocation4 + $0x224] ss:$16 sps:$4 sm:$0xff]  }
  0xd5   :  { %2634 = vmatprep.subr.bf16.mxu0 %v3848_v31  ;;  %v217_v31 = vrot.slane %v4399_v12, %v216_v25 }
  0xd6   :  { %2797 = vmatpush1.bf16.msra.mxu1 %v3843_v38 }
  0xd7   :  { %2798 = vmatprep.subr.bf16.mxu1 %v3851_v40  ;;  %v3912_v40 = vld [vmem:[#allocation4 + $0x240] ss:$16 sps:$4 sm:$0xff]  }
  0xd8   :  { %2635 = vmatpush1.bf16.msra.mxu0 %v3846_v33  ;;  %v3909_v33 = vld [vmem:[#allocation4 + $0x228] ss:$16 sps:$4 sm:$0xff]  }
  0xd9   :  { %2636 = vmatprep.subr.bf16.mxu0 %v3854_v35  ;;  %v3917_v35 = vld [vmem:[#allocation4 + $0x24c] ss:$16 sps:$4 sm:$0xff]  }
  0xda   :  { %2799 = vmatpush1.bf16.msra.mxu1 %v3849_v42 }
  0xdb   :  { %2800 = vmatprep.subr.bf16.mxu1 %v3857_v44  ;;  %v3923_v44 = vld [vmem:[#allocation4 + $0x26c] ss:$16 sps:$4 sm:$0xff]  }
  0xdc   :  { %2637 = vmatpush1.bf16.msra.mxu0 %v3852_v37 }
  0xdd   :  { %2638 = vmatprep.subr.bf16.mxu0 %v3860_v39 }
  0xde   :  { %2801 = vmatpush1.bf16.msra.mxu1 %v3855_v46 }
  0xdf   :  { %2802 = vmatprep.subr.bf16.mxu1 %v3863_v48  ;;  %v3921_v48 = vld [vmem:[#allocation4 + $0x268] ss:$16 sps:$4 sm:$0xff]  }
  0xe0   :  { %2639 = vmatpush1.bf16.msra.mxu0 %v3858_v41  ;;  %v3915_v41 = vld [vmem:[#allocation4 + $0x248] ss:$16 sps:$4 sm:$0xff]  }
  0xe1   :  { %2640 = vmatprep.subr.bf16.mxu0 %v3866_v43  ;;  %v3920_v43 = vld [vmem:[#allocation4 + $0x264] ss:$16 sps:$4 sm:$0xff]  }
  0xe2   :  { %2803 = vmatpush1.bf16.msra.mxu1 %v3861_v23  ;;  %v3929_v23 = vld [vmem:[#allocation4 + $0x28c] ss:$16 sps:$4 sm:$0xff]  }
  0xe3   :  { %2804 = vmatprep.subr.bf16.mxu1 %v3869_v51  ;;  %v3927_v51 = vld [vmem:[#allocation4 + $0x288] ss:$16 sps:$4 sm:$0xff]  }
  0xe4   :  { %2641 = vmatpush1.bf16.msra.mxu0 %v3864_v45 }
  0xe5   :  { %2642 = vmatprep.subr.bf16.mxu0 %v3872_v47  ;;  %v3918_v47 = vld [vmem:[#allocation4 + $0x260] ss:$16 sps:$4 sm:$0xff]  }
  0xe6   :  { %2805 = vmatpush1.bf16.msra.mxu1 %v3867_v53  ;;  %v3935_v53 = vld [vmem:[#allocation4 + $0x2ac] ss:$16 sps:$4 sm:$0xff]  }
  0xe7   :  { %2806 = vmatprep.subr.bf16.mxu1 %v3875_v55  ;;  %v3933_v55 = vld [vmem:[#allocation4 + $0x2a8] ss:$16 sps:$4 sm:$0xff]  }
  0xe8   :  { %2643 = vmatpush1.bf16.msra.mxu0 %v3870_v49  ;;  %v3926_v49 = vld [vmem:[#allocation4 + $0x284] ss:$16 sps:$4 sm:$0xff]  }
  0xe9   :  { %2644 = vmatprep.subr.bf16.mxu0 %v3878_v50  ;;  %v3924_v50 = vld [vmem:[#allocation4 + $0x280] ss:$16 sps:$4 sm:$0xff]  }
  0xea   :  { %2807 = vmatpush1.bf16.msra.mxu1 %v3873_v58  ;;  %v3936_v58 = vld [vmem:[#allocation4 + $0x2c0] ss:$16 sps:$4 sm:$0xff]  }
  0xeb   :  { %2808 = vmatprep.subr.bf16.mxu1 %v3881_v59  ;;  %v3939_v59 = vld [vmem:[#allocation4 + $0x2c8] ss:$16 sps:$4 sm:$0xff]  }
  0xec   :  { %2645 = vmatpush1.bf16.msra.mxu0 %v3876_v52  ;;  %v3932_v52 = vld [vmem:[#allocation4 + $0x2a4] ss:$16 sps:$4 sm:$0xff]  }
  0xed   :  { %2646 = vmatprep.subr.bf16.mxu0 %v3884_v54  ;;  %v3930_v54 = vld [vmem:[#allocation4 + $0x2a0] ss:$16 sps:$4 sm:$0xff]  }
  0xee   :  { %2809 = vmatpush1.bf16.msra.mxu1 %v3879_v62  ;;  %v3942_v62 = vld [vmem:[#allocation4 + $0x2e0] ss:$16 sps:$4 sm:$0xff]  }
  0xef   :  { %2810 = vmatprep.subr.bf16.mxu1 %v3887_v63  ;;  %v3945_v63 = vld [vmem:[#allocation4 + $0x2e8] ss:$16 sps:$4 sm:$0xff]  }
  0xf0   :  { %2647 = vmatpush1.bf16.msra.mxu0 %v3882_v56  ;;  %v3938_v56 = vld [vmem:[#allocation4 + $0x2c4] ss:$16 sps:$4 sm:$0xff]  }
  0xf1   :  { %2648 = vmatprep.subr.bf16.mxu0 %v3890_v57  ;;  %v3941_v57 = vld [vmem:[#allocation4 + $0x2cc] ss:$16 sps:$4 sm:$0xff]  }
  0xf2   :  { %2811 = vmatpush1.bf16.msra.mxu1 %v3885_v3  ;;  %v3948_v3 = vld [vmem:[#allocation4 + $0x300] ss:$16 sps:$4 sm:$0xff]  }
  0xf3   :  { %2812 = vmatprep.subr.bf16.mxu1 %v3893_v4  ;;  %v3951_v4 = vld [vmem:[#allocation4 + $0x308] ss:$16 sps:$4 sm:$0xff]  }
  0xf4   :  { %2649 = vmatpush1.bf16.msra.mxu0 %v3888_v60  ;;  %v3944_v60 = vld [vmem:[#allocation4 + $0x2e4] ss:$16 sps:$4 sm:$0xff]  }
  0xf5   :  { %2650 = vmatprep.subr.bf16.mxu0 %v3896_v61  ;;  %v3947_v61 = vld [vmem:[#allocation4 + $0x2ec] ss:$16 sps:$4 sm:$0xff]  }
  0xf6   :  { %2813 = vmatpush1.bf16.msra.mxu1 %v3891_v5  ;;  %v3956_v5 = vld [vmem:[#allocation4 + $0x324] ss:$16 sps:$4 sm:$0xff]  }
  0xf7   :  { %2814 = vmatprep.subr.bf16.mxu1 %v3899_v6  ;;  %v3959_v6 = vld [vmem:[#allocation4 + $0x32c] ss:$16 sps:$4 sm:$0xff]  }
  0xf8   :  { %2651 = vmatpush1.bf16.msra.mxu0 %v3894_v0  ;;  %v3950_v0 = vld [vmem:[#allocation4 + $0x304] ss:$16 sps:$4 sm:$0xff]  }
  0xf9   :  { %2661 = vmatprep.subr.bf16.mxu0 %v3902_v1  ;;  %v3953_v1 = vld [vmem:[#allocation4 + $0x30c] ss:$16 sps:$4 sm:$0xff]  }
  0xfa   :  { %2815 = vmatpush1.bf16.msra.mxu1 %v3897_v7  ;;  %v3954_v7 = vld [vmem:[#allocation4 + $0x320] ss:$16 sps:$4 sm:$0xff]  }
  0xfb   :  { %2825 = vmatprep.subr.bf16.mxu1 %v3905_v8  ;;  %v3957_v8 = vld [vmem:[#allocation4 + $0x328] ss:$16 sps:$4 sm:$0xff]  }
 0x14e   :  { %v916_v16 = vpop.f32.mrb[0].mxu0 }
 0x14f   :  { %v917_v17 = vadd.f32 %v916_v16, %v205_v14  ;;  %v918_v18 = vpop.f32.mrb[1].mxu0  ;;  %v3965_v14 = vld [vmem:[#allocation4 + $0x34c] ss:$16 sps:$4 sm:$0xff]   ;;  %v3963_v16 = vld [vmem:[#allocation4 + $0x348] ss:$16 sps:$4 sm:$0xff]  }
 0x150   :  { %v919_v19 = vadd.f32 %v918_v18, %v209_v15  ;;  %v920_v20 = vpop.f32.mrb[2].mxu0  ;;  %v4412_v36 = vpop.f32.mrb[0].mxu1  ;;  %v3960_v15 = vld [vmem:[#allocation4 + $0x340] ss:$16 sps:$4 sm:$0xff]   ;;  %v3971_v18 = vld [vmem:[#allocation4 + $0x36c] ss:$16 sps:$4 sm:$0xff]  }
 0x151   :  { %v1046_v21 = vmax.f32 %v917_v17, 0.0  ;;  %v921_v22 = vpop.f32.mrb[3].mxu0  ;;  %v959_v37 = vpop.f32.mrb[1].mxu1  ;;  %v3968_v17 = vld [vmem:[#allocation4 + $0x364] ss:$16 sps:$4 sm:$0xff]  }
 0x152   :  { %v1047_v24 = vmax.f32 %v919_v19, 0.0  ;;  %v960_v38 = vadd.f32 %v959_v37, %v217_v31  ;;  %v961_v39 = vpop.f32.mrb[2].mxu1  ;;  %v3966_v19 = vld [vmem:[#allocation4 + $0x360] ss:$16 sps:$4 sm:$0xff]   ;;  %v3969_v20 = vld [vmem:[#allocation4 + $0x368] ss:$16 sps:$4 sm:$0xff]  }
 0x153   :  { %v1054_v29 = vpack.c.bf16 %v1046_v21, %v1046_v21  ;;  %v962_v42 = vpop.f32.mrb[3].mxu1  ;;  %v3974_v21 = vld [vmem:[#allocation4 + $0x384] ss:$16 sps:$4 sm:$0xff]   ;;  %v3977_v22 = vld [vmem:[#allocation4 + $0x38c] ss:$16 sps:$4 sm:$0xff]  }
 0x154   :  { %v1055_v26 = vpack.c.bf16 %v1047_v24, %v1047_v24  ;;  %v1049_v45 = vmax.f32 %v960_v38, 0.0  ;;  %v212_v24 = vsub.s32 2, %v4393_v10  ;;  %v3981_v31 = vld [vmem:[#allocation4 + $0x3a8] ss:$16 sps:$4 sm:$0xff]   ;;  %v3984_v37 = vld [vmem:[#allocation4 + $0x3c0] ss:$16 sps:$4 sm:$0xff]  }
 0x155   :  { %v3987_v38 = vld [vmem:[#allocation4 + $0x3c8] ss:$16 sps:$4 sm:$0xff]  }
 0x156   :  { %2652 = vmatprep.mubr.bf16.mxu0 %v1055_v26  ;;  %2816 = vmatprep.mubr.bf16.mxu1 %v1055_v26  ;;  %v1057_v46 = vpack.c.bf16 %v1049_v45, %v1049_v45  ;;  %v3972_v26 = vld [vmem:[#allocation4 + $0x380] ss:$16 sps:$4 sm:$0xff]  }
 0x157   :  { %2653 = vmatmul.mubr.bf16.vlgmr.msra.gmra.mrb[8].mxu0 %v1054_v29  ;;  %2817 = vmatmul.mubr.bf16.vlgmr.msra.gmra.mrb[8].mxu1 %v1054_v29  ;;  %v3983_v29 = vld [vmem:[#allocation4 + $0x3ac] ss:$16 sps:$4 sm:$0xff]   ;;  %v3990_v45 = vld [vmem:[#allocation4 + $0x3e0] ss:$16 sps:$4 sm:$0xff]  }
 0x158   :  { %2662 = vmatpush1.bf16.msra.mxu0 %v3900_v27  ;;  %2826 = vmatpush1.bf16.msra.mxu1 %v3903_v28  ;;  %v3975_v27 = vld [vmem:[#allocation4 + $0x388] ss:$16 sps:$4 sm:$0xff]   ;;  %v3980_v28 = vld [vmem:[#allocation4 + $0x3a4] ss:$16 sps:$4 sm:$0xff]  }
 0x159   :  { %2663 = vmatprep.subr.bf16.mxu0 %v3908_v2  ;;  %2827 = vmatprep.subr.bf16.mxu1 %v3911_v30  ;;  %v213_v2 = vrot.slane %v4399_v12, %v212_v24  ;;  %v3978_v30 = vld [vmem:[#allocation4 + $0x3a0] ss:$16 sps:$4 sm:$0xff]  }
 0x15a   :  { %2693 = vmatprep.mubr.bf16.mxu0 %v1057_v46  ;;  %2857 = vmatprep.mubr.bf16.mxu1 %v1057_v46  ;;  %v3993_v46 = vld [vmem:[#allocation4 + $0x3e8] ss:$16 sps:$4 sm:$0xff]  }
 0x15c   :  { %2664 = vmatpush1.bf16.msra.mxu0 %v3906_v32  ;;  %2828 = vmatpush1.bf16.msra.mxu1 %v3909_v33  ;;  %v224_v32 = vsub.s32 5, %v4393_v10  ;;  %v3986_v33 = vld [vmem:[#allocation4 + $0x3c4] ss:$16 sps:$4 sm:$0xff]  }
 0x15d   :  { %2665 = vmatprep.subr.bf16.mxu0 %v3914_v34  ;;  %2829 = vmatprep.subr.bf16.mxu1 %v3917_v35  ;;  %v3989_v34 = vld [vmem:[#allocation4 + $0x3cc] ss:$16 sps:$4 sm:$0xff]   ;;  %v958_v35 = vadd.f32 %v4412_v36, %v213_v2  ;;  %v4041_v2 = vld [vmem:[#allocation4 + $0x4e8] ss:$16 sps:$4 sm:$0xff]  }
 0x15e   :  { %v225_v39 = vrot.slane %v4399_v12, %v224_v32  ;;  %v4044_v32 = vld [vmem:[#allocation4 + $0x500] ss:$16 sps:$4 sm:$0xff]  }
 0x160   :  { %2666 = vmatpush1.bf16.msra.mxu0 %v3912_v40  ;;  %2830 = vmatpush1.bf16.msra.mxu1 %v3915_v41  ;;  %v3992_v40 = vld [vmem:[#allocation4 + $0x3e4] ss:$16 sps:$4 sm:$0xff]   ;;  %v3995_v41 = vld [vmem:[#allocation4 + $0x3ec] ss:$16 sps:$4 sm:$0xff]  }
 0x161   :  { %2667 = vmatprep.subr.bf16.mxu0 %v3920_v43  ;;  %2831 = vmatprep.subr.bf16.mxu1 %v3923_v44  ;;  %v1048_v43 = vmax.f32 %v958_v35, 0.0  ;;  %v4055_v35 = vld [vmem:[#allocation4 + $0x52c] ss:$16 sps:$4 sm:$0xff]  }
 0x164   :  { %2668 = vmatpush1.bf16.msra.mxu0 %v3918_v47  ;;  %2832 = vmatpush1.bf16.msra.mxu1 %v3921_v48  ;;  %v3998_v48 = vld [vmem:[#allocation4 + $0x404] ss:$16 sps:$4 sm:$0xff]  }
 0x165   :  { %2669 = vmatprep.subr.bf16.mxu0 %v3926_v49  ;;  %2833 = vmatprep.subr.bf16.mxu1 %v3929_v23  ;;  %v4001_v49 = vld [vmem:[#allocation4 + $0x40c] ss:$16 sps:$4 sm:$0xff]  }
 0x168   :  { %2670 = vmatpush1.bf16.msra.mxu0 %v3924_v50  ;;  %2834 = vmatpush1.bf16.msra.mxu1 %v3927_v51  ;;  %v1056_v51 = vpack.c.bf16 %v1048_v43, %v1048_v43  ;;  %v4059_v43 = vld [vmem:[#allocation4 + $0x548] ss:$16 sps:$4 sm:$0xff]  }
 0x169   :  { %2671 = vmatprep.subr.bf16.mxu0 %v3932_v52  ;;  %2835 = vmatprep.subr.bf16.mxu1 %v3935_v53  ;;  %v3996_v52 = vld [vmem:[#allocation4 + $0x400] ss:$16 sps:$4 sm:$0xff]   ;;  %v3999_v53 = vld [vmem:[#allocation4 + $0x408] ss:$16 sps:$4 sm:$0xff]  }
 0x16c   :  { %2672 = vmatpush1.bf16.msra.mxu0 %v3930_v54  ;;  %2836 = vmatpush1.bf16.msra.mxu1 %v3933_v55  ;;  %v4004_v54 = vld [vmem:[#allocation4 + $0x424] ss:$16 sps:$4 sm:$0xff]   ;;  %v4007_v55 = vld [vmem:[#allocation4 + $0x42c] ss:$16 sps:$4 sm:$0xff]  }
 0x16d   :  { %2673 = vmatprep.subr.bf16.mxu0 %v3938_v56  ;;  %2837 = vmatprep.subr.bf16.mxu1 %v3941_v57  ;;  %v4002_v57 = vld [vmem:[#allocation4 + $0x420] ss:$16 sps:$4 sm:$0xff]  }
 0x170   :  { %2674 = vmatpush1.bf16.msra.mxu0 %v3936_v58  ;;  %2838 = vmatpush1.bf16.msra.mxu1 %v3939_v59  ;;  %v4005_v58 = vld [vmem:[#allocation4 + $0x428] ss:$16 sps:$4 sm:$0xff]   ;;  %v4010_v59 = vld [vmem:[#allocation4 + $0x444] ss:$16 sps:$4 sm:$0xff]  }
 0x171   :  { %2675 = vmatprep.subr.bf16.mxu0 %v3944_v60  ;;  %2839 = vmatprep.subr.bf16.mxu1 %v3947_v61  ;;  %v4013_v60 = vld [vmem:[#allocation4 + $0x44c] ss:$16 sps:$4 sm:$0xff]  }
 0x174   :  { %2676 = vmatpush1.bf16.msra.mxu0 %v3942_v62  ;;  %2840 = vmatpush1.bf16.msra.mxu1 %v3945_v63 }
 0x175   :  { %2677 = vmatprep.subr.bf16.mxu0 %v3950_v0  ;;  %2841 = vmatprep.subr.bf16.mxu1 %v3953_v1  ;;  %v4008_v0 = vld [vmem:[#allocation4 + $0x440] ss:$16 sps:$4 sm:$0xff]   ;;  %v4011_v1 = vld [vmem:[#allocation4 + $0x448] ss:$16 sps:$4 sm:$0xff]  }
 0x178   :  { %2678 = vmatpush1.bf16.msra.mxu0 %v3948_v3  ;;  %2842 = vmatpush1.bf16.msra.mxu1 %v3951_v4  ;;  %v4016_v4 = vld [vmem:[#allocation4 + $0x464] ss:$16 sps:$4 sm:$0xff]  }
 0x179   :  { %2679 = vmatprep.subr.bf16.mxu0 %v3956_v5  ;;  %2843 = vmatprep.subr.bf16.mxu1 %v3959_v6  ;;  %v4019_v5 = vld [vmem:[#allocation4 + $0x46c] ss:$16 sps:$4 sm:$0xff]   ;;  %v4014_v6 = vld [vmem:[#allocation4 + $0x460] ss:$16 sps:$4 sm:$0xff]  }
 0x17c   :  { %2680 = vmatpush1.bf16.msra.mxu0 %v3954_v7  ;;  %2844 = vmatpush1.bf16.msra.mxu1 %v3957_v8  ;;  %v4017_v7 = vld [vmem:[#allocation4 + $0x468] ss:$16 sps:$4 sm:$0xff]   ;;  %v4022_v8 = vld [vmem:[#allocation4 + $0x484] ss:$16 sps:$4 sm:$0xff]  }
 0x17d   :  { %2681 = vmatprep.subr.bf16.mxu0 %v3962_v9  ;;  %2845 = vmatprep.subr.bf16.mxu1 %v3965_v14  ;;  %v4025_v9 = vld [vmem:[#allocation4 + $0x48c] ss:$16 sps:$4 sm:$0xff]   ;;  %v4020_v14 = vld [vmem:[#allocation4 + $0x480] ss:$16 sps:$4 sm:$0xff]  }
 0x180   :  { %2682 = vmatpush1.bf16.msra.mxu0 %v3960_v15  ;;  %2846 = vmatpush1.bf16.msra.mxu1 %v3963_v16  ;;  %v4023_v15 = vld [vmem:[#allocation4 + $0x488] ss:$16 sps:$4 sm:$0xff]   ;;  %v4028_v16 = vld [vmem:[#allocation4 + $0x4a4] ss:$16 sps:$4 sm:$0xff]  }
 0x181   :  { %2683 = vmatprep.subr.bf16.mxu0 %v3968_v17  ;;  %2847 = vmatprep.subr.bf16.mxu1 %v3971_v18  ;;  %v4031_v17 = vld [vmem:[#allocation4 + $0x4ac] ss:$16 sps:$4 sm:$0xff]   ;;  %v4026_v18 = vld [vmem:[#allocation4 + $0x4a0] ss:$16 sps:$4 sm:$0xff]  }
 0x184   :  { %2684 = vmatpush1.bf16.msra.mxu0 %v3966_v19  ;;  %2848 = vmatpush1.bf16.msra.mxu1 %v3969_v20  ;;  %v4029_v19 = vld [vmem:[#allocation4 + $0x4a8] ss:$16 sps:$4 sm:$0xff]   ;;  %v4034_v20 = vld [vmem:[#allocation4 + $0x4c4] ss:$16 sps:$4 sm:$0xff]  }
 0x185   :  { %2685 = vmatprep.subr.bf16.mxu0 %v3974_v21  ;;  %2849 = vmatprep.subr.bf16.mxu1 %v3977_v22  ;;  %v4037_v21 = vld [vmem:[#allocation4 + $0x4cc] ss:$16 sps:$4 sm:$0xff]   ;;  %v4032_v22 = vld [vmem:[#allocation4 + $0x4c0] ss:$16 sps:$4 sm:$0xff]  }
 0x188   :  { %2686 = vmatpush1.bf16.msra.mxu0 %v3972_v26  ;;  %2850 = vmatpush1.bf16.msra.mxu1 %v3975_v27  ;;  %v4035_v26 = vld [vmem:[#allocation4 + $0x4c8] ss:$16 sps:$4 sm:$0xff]   ;;  %v4040_v27 = vld [vmem:[#allocation4 + $0x4e4] ss:$16 sps:$4 sm:$0xff]  }
 0x189   :  { %2687 = vmatprep.subr.bf16.mxu0 %v3980_v28  ;;  %2851 = vmatprep.subr.bf16.mxu1 %v3983_v29  ;;  %v4043_v28 = vld [vmem:[#allocation4 + $0x4ec] ss:$16 sps:$4 sm:$0xff]   ;;  %v4038_v29 = vld [vmem:[#allocation4 + $0x4e0] ss:$16 sps:$4 sm:$0xff]  }
 0x18c   :  { %2688 = vmatpush1.bf16.msra.mxu0 %v3978_v30  ;;  %2852 = vmatpush1.bf16.msra.mxu1 %v3981_v31  ;;  %v4046_v30 = vld [vmem:[#allocation4 + $0x504] ss:$16 sps:$4 sm:$0xff]   ;;  %v4049_v31 = vld [vmem:[#allocation4 + $0x50c] ss:$16 sps:$4 sm:$0xff]  }
 0x18d   :  { %2689 = vmatprep.subr.bf16.mxu0 %v3986_v33  ;;  %2853 = vmatprep.subr.bf16.mxu1 %v3989_v34  ;;  %v4047_v33 = vld [vmem:[#allocation4 + $0x508] ss:$16 sps:$4 sm:$0xff]   ;;  %v4052_v34 = vld [vmem:[#allocation4 + $0x524] ss:$16 sps:$4 sm:$0xff]  }
 0x18e   :  { %v4421_v42 = vpop.f32.mrb[4].mxu0 }
 0x18f   :  { %v1000_v44 = vpop.f32.mrb[5].mxu0 }
 0x190   :  { %2690 = vmatpush1.bf16.msra.mxu0 %v3984_v37  ;;  %2854 = vmatpush1.bf16.msra.mxu1 %v3987_v38  ;;  %v1001_v47 = vadd.f32 %v1000_v44, %v225_v39  ;;  %v1002_v36 = vpop.f32.mrb[6].mxu0  ;;  %v4423_v61 = vpop.f32.mrb[4].mxu1  ;;  %v4050_v37 = vld [vmem:[#allocation4 + $0x520] ss:$16 sps:$4 sm:$0xff]   ;;  %v4053_v38 = vld [vmem:[#allocation4 + $0x528] ss:$16 sps:$4 sm:$0xff]  }
 0x191   :  { %2691 = vmatprep.subr.bf16.mxu0 %v3992_v40  ;;  %2855 = vmatprep.subr.bf16.mxu1 %v3995_v41  ;;  %v1003_v23 = vpop.f32.mrb[7].mxu0  ;;  %v4425_v62 = vpop.f32.mrb[5].mxu1  ;;  %v4058_v39 = vld [vmem:[#allocation4 + $0x544] ss:$16 sps:$4 sm:$0xff]   ;;  %v4061_v40 = vld [vmem:[#allocation4 + $0x54c] ss:$16 sps:$4 sm:$0xff]  }
 0x192   :  { %v1051_v50 = vmax.f32 %v1001_v47, 0.0  ;;  %v1043_v63 = vpop.f32.mrb[6].mxu1  ;;  %v4056_v41 = vld [vmem:[#allocation4 + $0x540] ss:$16 sps:$4 sm:$0xff]   ;;  %v4064_v44 = vld [vmem:[#allocation4 + $0x564] ss:$16 sps:$4 sm:$0xff]  }
 0x193   :  { %v1044_v3 = vpop.f32.mrb[7].mxu1  ;;  %v4065_v47 = vld [vmem:[#allocation4 + $0x568] ss:$16 sps:$4 sm:$0xff]   ;;  %v4070_v36 = vld [vmem:[#allocation4 + $0x584] ss:$16 sps:$4 sm:$0xff]  }
 0x194   :  { %2692 = vmatpush1.bf16.msra.mxu0 %v3990_v45  ;;  %2856 = vmatpush1.bf16.msra.mxu1 %v3993_v46  ;;  %v1059_v56 = vpack.c.bf16 %v1051_v50, %v1051_v50  ;;  %v4067_v45 = vld [vmem:[#allocation4 + $0x56c] ss:$16 sps:$4 sm:$0xff]   ;;  %v4062_v46 = vld [vmem:[#allocation4 + $0x560] ss:$16 sps:$4 sm:$0xff]   ;;  %v4071_v50 = vld [vmem:[#allocation4 + $0x588] ss:$16 sps:$4 sm:$0xff]  }
 0x195   :  { %2702 = vmatprep.subr.bf16.mxu0 %v3998_v48  ;;  %2866 = vmatprep.subr.bf16.mxu1 %v4001_v49  ;;  %v4073_v48 = vld [vmem:[#allocation4 + $0x58c] ss:$16 sps:$4 sm:$0xff]   ;;  %v220_v49 = vsub.s32 4, %v4393_v10  ;;  %v4068_v23 = vld [vmem:[#allocation4 + $0x580] ss:$16 sps:$4 sm:$0xff]  }
 0x196   :  { %v4080_v63 = vld [vmem:[#allocation4 + $0x5c0] ss:$16 sps:$4 sm:$0xff]   ;;  %v4091_v3 = vld [vmem:[#allocation4 + $0x5ec] ss:$16 sps:$4 sm:$0xff]  }
 0x197   :  { %2694 = vmatmul.mubr.bf16.vlgmr.msra.gmra.mrb[8].mxu0 %v1056_v51  ;;  %2858 = vmatmul.mubr.bf16.vlgmr.msra.gmra.mrb[8].mxu1 %v1056_v51  ;;  %v4076_v51 = vld [vmem:[#allocation4 + $0x5a4] ss:$16 sps:$4 sm:$0xff]  }
 0x198   :  { %2703 = vmatpush1.bf16.msra.mxu0 %v3996_v52  ;;  %2867 = vmatpush1.bf16.msra.mxu1 %v3999_v53  ;;  %v4079_v52 = vld [vmem:[#allocation4 + $0x5ac] ss:$16 sps:$4 sm:$0xff]   ;;  %v232_v53 = vsub.s32 7, %v4393_v10 }
 0x199   :  { %2704 = vmatprep.subr.bf16.mxu0 %v4004_v54  ;;  %2868 = vmatprep.subr.bf16.mxu1 %v4007_v55  ;;  %v221_v54 = vrot.slane %v4399_v12, %v220_v49  ;;  %v4074_v55 = vld [vmem:[#allocation4 + $0x5a0] ss:$16 sps:$4 sm:$0xff]   ;;  %v4145_v49 = vld [vmem:[#allocation4 + $0x70c] ss:$16 sps:$4 sm:$0xff]  }
 0x19a   :  { %2734 = vmatprep.mubr.bf16.mxu0 %v1059_v56  ;;  %2898 = vmatprep.mubr.bf16.mxu1 %v1059_v56  ;;  %v4077_v56 = vld [vmem:[#allocation4 + $0x5a8] ss:$16 sps:$4 sm:$0xff]  }
 0x19c   :  { %2705 = vmatpush1.bf16.msra.mxu0 %v4002_v57  ;;  %2869 = vmatpush1.bf16.msra.mxu1 %v4005_v58  ;;  %v4082_v57 = vld [vmem:[#allocation4 + $0x5c4] ss:$16 sps:$4 sm:$0xff]   ;;  %v4085_v58 = vld [vmem:[#allocation4 + $0x5cc] ss:$16 sps:$4 sm:$0xff]  }
 0x19d   :  { %2706 = vmatprep.subr.bf16.mxu0 %v4010_v59  ;;  %2870 = vmatprep.subr.bf16.mxu1 %v4013_v60  ;;  %v233_v59 = vrot.slane %v4399_v12, %v232_v53  ;;  %v999_v60 = vadd.f32 %v4421_v42, %v221_v54  ;;  %v4146_v53 = vld [vmem:[#allocation4 + $0x720] ss:$16 sps:$4 sm:$0xff]   ;;  %v4149_v54 = vld [vmem:[#allocation4 + $0x728] ss:$16 sps:$4 sm:$0xff]  }
 0x1a0   :  { %2707 = vmatpush1.bf16.msra.mxu0 %v4008_v0  ;;  %2871 = vmatpush1.bf16.msra.mxu1 %v4011_v1  ;;  %v4083_v0 = vld [vmem:[#allocation4 + $0x5c8] ss:$16 sps:$4 sm:$0xff]   ;;  %v4088_v1 = vld [vmem:[#allocation4 + $0x5e4] ss:$16 sps:$4 sm:$0xff]  }
 0x1a1   :  { %2708 = vmatprep.subr.bf16.mxu0 %v4016_v4  ;;  %2872 = vmatprep.subr.bf16.mxu1 %v4019_v5  ;;  %v1042_v4 = vadd.f32 %v4425_v62, %v233_v59  ;;  %v1050_v5 = vmax.f32 %v999_v60, 0.0  ;;  %v4160_v59 = vld [vmem:[#allocation4 + $0x764] ss:$16 sps:$4 sm:$0xff]   ;;  %v4163_v60 = vld [vmem:[#allocation4 + $0x76c] ss:$16 sps:$4 sm:$0xff]  }
 0x1a3   :  { %v1053_v42 = vmax.f32 %v1042_v4, 0.0  ;;  %v4164_v4 = vld [vmem:[#allocation4 + $0x780] ss:$16 sps:$4 sm:$0xff]  }
 0x1a4   :  { %2709 = vmatpush1.bf16.msra.mxu0 %v4014_v6  ;;  %2873 = vmatpush1.bf16.msra.mxu1 %v4017_v7  ;;  %v4086_v6 = vld [vmem:[#allocation4 + $0x5e0] ss:$16 sps:$4 sm:$0xff]   ;;  %v4089_v7 = vld [vmem:[#allocation4 + $0x5e8] ss:$16 sps:$4 sm:$0xff]  }
 0x1a5   :  { %2710 = vmatprep.subr.bf16.mxu0 %v4022_v8  ;;  %2874 = vmatprep.subr.bf16.mxu1 %v4025_v9  ;;  %v4094_v8 = vld [vmem:[#allocation4 + $0x604] ss:$16 sps:$4 sm:$0xff]   ;;  %v4097_v9 = vld [vmem:[#allocation4 + $0x60c] ss:$16 sps:$4 sm:$0xff]   ;;  %v1061_v62 = vpack.c.bf16 %v1053_v42, %v1053_v42  ;;  %v4173_v42 = vld [vmem:[#allocation4 + $0x7a8] ss:$16 sps:$4 sm:$0xff]  }
 0x1a8   :  { %2711 = vmatpush1.bf16.msra.mxu0 %v4020_v14  ;;  %2875 = vmatpush1.bf16.msra.mxu1 %v4023_v15  ;;  %v1058_v14 = vpack.c.bf16 %v1050_v5, %v1050_v5  ;;  %v4092_v15 = vld [vmem:[#allocation4 + $0x600] ss:$16 sps:$4 sm:$0xff]   ;;  %v4167_v5 = vld [vmem:[#allocation4 + $0x788] ss:$16 sps:$4 sm:$0xff]  }
 0x1a9   :  { %2712 = vmatprep.subr.bf16.mxu0 %v4028_v16  ;;  %2876 = vmatprep.subr.bf16.mxu1 %v4031_v17  ;;  %v4095_v16 = vld [vmem:[#allocation4 + $0x608] ss:$16 sps:$4 sm:$0xff]   ;;  %v4100_v17 = vld [vmem:[#allocation4 + $0x624] ss:$16 sps:$4 sm:$0xff]  }
 0x1ac   :  { %2713 = vmatpush1.bf16.msra.mxu0 %v4026_v18  ;;  %2877 = vmatpush1.bf16.msra.mxu1 %v4029_v19  ;;  %v4103_v18 = vld [vmem:[#allocation4 + $0x62c] ss:$16 sps:$4 sm:$0xff]   ;;  %v4098_v19 = vld [vmem:[#allocation4 + $0x620] ss:$16 sps:$4 sm:$0xff]  }
 0x1ad   :  { %2714 = vmatprep.subr.bf16.mxu0 %v4034_v20  ;;  %2878 = vmatprep.subr.bf16.mxu1 %v4037_v21  ;;  %v4101_v20 = vld [vmem:[#allocation4 + $0x628] ss:$16 sps:$4 sm:$0xff]   ;;  %v4106_v21 = vld [vmem:[#allocation4 + $0x644] ss:$16 sps:$4 sm:$0xff]  }
 0x1b0   :  { %2715 = vmatpush1.bf16.msra.mxu0 %v4032_v22  ;;  %2879 = vmatpush1.bf16.msra.mxu1 %v4035_v26  ;;  %v4109_v22 = vld [vmem:[#allocation4 + $0x64c] ss:$16 sps:$4 sm:$0xff]   ;;  %v4104_v26 = vld [vmem:[#allocation4 + $0x640] ss:$16 sps:$4 sm:$0xff]  }
 0x1b1   :  { %2716 = vmatprep.subr.bf16.mxu0 %v4040_v27  ;;  %2880 = vmatprep.subr.bf16.mxu1 %v4043_v28  ;;  %v4107_v27 = vld [vmem:[#allocation4 + $0x648] ss:$16 sps:$4 sm:$0xff]   ;;  %v4112_v28 = vld [vmem:[#allocation4 + $0x664] ss:$16 sps:$4 sm:$0xff]  }
 0x1b4   :  { %2717 = vmatpush1.bf16.msra.mxu0 %v4038_v29  ;;  %2881 = vmatpush1.bf16.msra.mxu1 %v4041_v2  ;;  %v4115_v29 = vld [vmem:[#allocation4 + $0x66c] ss:$16 sps:$4 sm:$0xff]   ;;  %v4110_v2 = vld [vmem:[#allocation4 + $0x660] ss:$16 sps:$4 sm:$0xff]  }
 0x1b5   :  { %2718 = vmatprep.subr.bf16.mxu0 %v4046_v30  ;;  %2882 = vmatprep.subr.bf16.mxu1 %v4049_v31  ;;  %v4113_v30 = vld [vmem:[#allocation4 + $0x668] ss:$16 sps:$4 sm:$0xff]   ;;  %v4118_v31 = vld [vmem:[#allocation4 + $0x684] ss:$16 sps:$4 sm:$0xff]  }
 0x1b8   :  { %2719 = vmatpush1.bf16.msra.mxu0 %v4044_v32  ;;  %2883 = vmatpush1.bf16.msra.mxu1 %v4047_v33  ;;  %v4121_v32 = vld [vmem:[#allocation4 + $0x68c] ss:$16 sps:$4 sm:$0xff]   ;;  %v4116_v33 = vld [vmem:[#allocation4 + $0x680] ss:$16 sps:$4 sm:$0xff]  }
 0x1b9   :  { %2720 = vmatprep.subr.bf16.mxu0 %v4052_v34  ;;  %2884 = vmatprep.subr.bf16.mxu1 %v4055_v35  ;;  %v4119_v34 = vld [vmem:[#allocation4 + $0x688] ss:$16 sps:$4 sm:$0xff]   ;;  %v4124_v35 = vld [vmem:[#allocation4 + $0x6a4] ss:$16 sps:$4 sm:$0xff]  }
 0x1bc   :  { %2721 = vmatpush1.bf16.msra.mxu0 %v4050_v37  ;;  %2885 = vmatpush1.bf16.msra.mxu1 %v4053_v38  ;;  %v4127_v37 = vld [vmem:[#allocation4 + $0x6ac] ss:$16 sps:$4 sm:$0xff]   ;;  %v4122_v38 = vld [vmem:[#allocation4 + $0x6a0] ss:$16 sps:$4 sm:$0xff]  }
 0x1bd   :  { %2722 = vmatprep.subr.bf16.mxu0 %v4058_v39  ;;  %2886 = vmatprep.subr.bf16.mxu1 %v4061_v40  ;;  %v4125_v39 = vld [vmem:[#allocation4 + $0x6a8] ss:$16 sps:$4 sm:$0xff]   ;;  %v4130_v40 = vld [vmem:[#allocation4 + $0x6c4] ss:$16 sps:$4 sm:$0xff]  }
 0x1c0   :  { %2723 = vmatpush1.bf16.msra.mxu0 %v4056_v41  ;;  %2887 = vmatpush1.bf16.msra.mxu1 %v4059_v43  ;;  %v4133_v41 = vld [vmem:[#allocation4 + $0x6cc] ss:$16 sps:$4 sm:$0xff]   ;;  %v4128_v43 = vld [vmem:[#allocation4 + $0x6c0] ss:$16 sps:$4 sm:$0xff]  }
 0x1c1   :  { %2724 = vmatprep.subr.bf16.mxu0 %v4064_v44  ;;  %2888 = vmatprep.subr.bf16.mxu1 %v4067_v45  ;;  %v4131_v44 = vld [vmem:[#allocation4 + $0x6c8] ss:$16 sps:$4 sm:$0xff]   ;;  %v4136_v45 = vld [vmem:[#allocation4 + $0x6e4] ss:$16 sps:$4 sm:$0xff]  }
 0x1c4   :  { %2725 = vmatpush1.bf16.msra.mxu0 %v4062_v46  ;;  %2889 = vmatpush1.bf16.msra.mxu1 %v4065_v47  ;;  %v4139_v46 = vld [vmem:[#allocation4 + $0x6ec] ss:$16 sps:$4 sm:$0xff]   ;;  %v4134_v47 = vld [vmem:[#allocation4 + $0x6e0] ss:$16 sps:$4 sm:$0xff]  }
 0x1c5   :  { %2726 = vmatprep.subr.bf16.mxu0 %v4070_v36  ;;  %2890 = vmatprep.subr.bf16.mxu1 %v4073_v48  ;;  %v4137_v36 = vld [vmem:[#allocation4 + $0x6e8] ss:$16 sps:$4 sm:$0xff]   ;;  %v4142_v48 = vld [vmem:[#allocation4 + $0x704] ss:$16 sps:$4 sm:$0xff]  }
 0x1c8   :  { %2727 = vmatpush1.bf16.msra.mxu0 %v4068_v23  ;;  %2891 = vmatpush1.bf16.msra.mxu1 %v4071_v50  ;;  %v4140_v23 = vld [vmem:[#allocation4 + $0x700] ss:$16 sps:$4 sm:$0xff]   ;;  %v4143_v50 = vld [vmem:[#allocation4 + $0x708] ss:$16 sps:$4 sm:$0xff]  }
 0x1c9   :  { %2728 = vmatprep.subr.bf16.mxu0 %v4076_v51  ;;  %2892 = vmatprep.subr.bf16.mxu1 %v4079_v52  ;;  %v4148_v51 = vld [vmem:[#allocation4 + $0x724] ss:$16 sps:$4 sm:$0xff]   ;;  %v4151_v52 = vld [vmem:[#allocation4 + $0x72c] ss:$16 sps:$4 sm:$0xff]  }
 0x1cc   :  { %2729 = vmatpush1.bf16.msra.mxu0 %v4074_v55  ;;  %2893 = vmatpush1.bf16.msra.mxu1 %v4077_v56  ;;  %v4154_v55 = vld [vmem:[#allocation4 + $0x744] ss:$16 sps:$4 sm:$0xff]   ;;  %v4157_v56 = vld [vmem:[#allocation4 + $0x74c] ss:$16 sps:$4 sm:$0xff]  }
 0x1cd   :  { %2730 = vmatprep.subr.bf16.mxu0 %v4082_v57  ;;  %2894 = vmatprep.subr.bf16.mxu1 %v4085_v58  ;;  %v4152_v57 = vld [vmem:[#allocation4 + $0x740] ss:$16 sps:$4 sm:$0xff]   ;;  %v4155_v58 = vld [vmem:[#allocation4 + $0x748] ss:$16 sps:$4 sm:$0xff]  }
 0x1d0   :  { %2731 = vmatpush1.bf16.msra.mxu0 %v4080_v63  ;;  %2895 = vmatpush1.bf16.msra.mxu1 %v4083_v0  ;;  %v4158_v63 = vld [vmem:[#allocation4 + $0x760] ss:$16 sps:$4 sm:$0xff]   ;;  %v4161_v0 = vld [vmem:[#allocation4 + $0x768] ss:$16 sps:$4 sm:$0xff]  }
 0x1d1   :  { %2732 = vmatprep.subr.bf16.mxu0 %v4088_v1  ;;  %2896 = vmatprep.subr.bf16.mxu1 %v4091_v3  ;;  %v4166_v1 = vld [vmem:[#allocation4 + $0x784] ss:$16 sps:$4 sm:$0xff]   ;;  %v4169_v3 = vld [vmem:[#allocation4 + $0x78c] ss:$16 sps:$4 sm:$0xff]  }
 0x1d4   :  { %2733 = vmatpush1.bf16.msra.mxu0 %v4086_v6  ;;  %2897 = vmatpush1.bf16.msra.mxu1 %v4089_v7  ;;  %v228_v6 = vsub.s32 6, %v4393_v10  ;;  %v4172_v7 = vld [vmem:[#allocation4 + $0x7a4] ss:$16 sps:$4 sm:$0xff]  }
 0x1d5   :  { %2743 = vmatprep.subr.bf16.mxu0 %v4094_v8  ;;  %2907 = vmatprep.subr.bf16.mxu1 %v4097_v9  ;;  %v4175_v8 = vld [vmem:[#allocation4 + $0x7ac] ss:$16 sps:$4 sm:$0xff]   ;;  %v4170_v9 = vld [vmem:[#allocation4 + $0x7a0] ss:$16 sps:$4 sm:$0xff]  }
 0x1d7   :  { %2735 = vmatmul.mubr.bf16.vlgmr.msra.gmra.mrb[8].mxu0 %v1058_v14  ;;  %2899 = vmatmul.mubr.bf16.vlgmr.msra.gmra.mrb[8].mxu1 %v1058_v14  ;;  %v229_v14 = vrot.slane %v4399_v12, %v228_v6  ;;  %v4188_v12 = vld [vmem:[#allocation6 + $0x40] sm:$0xff]  }
 0x1d8   :  { %2744 = vmatpush1.bf16.msra.mxu0 %v4092_v15  ;;  %2908 = vmatpush1.bf16.msra.mxu1 %v4095_v16  ;;  %v4178_v15 = vld [vmem:[#allocation4 + $0x7c4] ss:$16 sps:$4 sm:$0xff]   ;;  %v4181_v16 = vld [vmem:[#allocation4 + $0x7cc] ss:$16 sps:$4 sm:$0xff]  }
 0x1d9   :  { %2745 = vmatprep.subr.bf16.mxu0 %v4100_v17  ;;  %2909 = vmatprep.subr.bf16.mxu1 %v4103_v18  ;;  %v4176_v17 = vld [vmem:[#allocation4 + $0x7c0] ss:$16 sps:$4 sm:$0xff]   ;;  %v4179_v18 = vld [vmem:[#allocation4 + $0x7c8] ss:$16 sps:$4 sm:$0xff]  }
 0x1da   :  { %2775 = vmatprep.mubr.bf16.mxu0 %v1061_v62  ;;  %2939 = vmatprep.mubr.bf16.mxu1 %v1061_v62  ;;  %v1040_v62 = vadd.f32 %v4423_v61, %v229_v14  ;;  %v4192_v61 = vld [vmem:[#allocation6 + $0x48] sm:$0xff]  }
 0x1dc   :  { %2746 = vmatpush1.bf16.msra.mxu0 %v4098_v19  ;;  %2910 = vmatpush1.bf16.msra.mxu1 %v4101_v20  ;;  %v4184_v19 = vld [vmem:[#allocation4 + $0x7e4] ss:$16 sps:$4 sm:$0xff]   ;;  %v4187_v20 = vld [vmem:[#allocation4 + $0x7ec] ss:$16 sps:$4 sm:$0xff]  }
 0x1dd   :  { %2747 = vmatprep.subr.bf16.mxu0 %v4106_v21  ;;  %2911 = vmatprep.subr.bf16.mxu1 %v4109_v22  ;;  %v4182_v21 = vld [vmem:[#allocation4 + $0x7e0] ss:$16 sps:$4 sm:$0xff]   ;;  %v4185_v22 = vld [vmem:[#allocation4 + $0x7e8] ss:$16 sps:$4 sm:$0xff]  }
 0x1e0   :  { %2748 = vmatpush1.bf16.msra.mxu0 %v4104_v26  ;;  %2912 = vmatpush1.bf16.msra.mxu1 %v4107_v27  ;;  %v1052_v26 = vmax.f32 %v1040_v62, 0.0  ;;  %v4189_v27 = vld [vmem:[#allocation6 + $0xc0] sm:$0xff]  }
 0x1e1   :  { %2749 = vmatprep.subr.bf16.mxu0 %v4112_v28  ;;  %2913 = vmatprep.subr.bf16.mxu1 %v4115_v29  ;;  %v4190_v28 = vld [vmem:[#allocation6] sm:$0xff]  }
 0x1e2   :  { %v4191_v29 = vld [vmem:[#allocation6 + $0x80] sm:$0xff]  }
 0x1e4   :  { %2750 = vmatpush1.bf16.msra.mxu0 %v4110_v2  ;;  %2914 = vmatpush1.bf16.msra.mxu1 %v4113_v30  ;;  %v1060_v2 = vpack.c.bf16 %v1052_v26, %v1052_v26  ;;  %v4193_v30 = vld [vmem:[#allocation6 + $0xc8] sm:$0xff]  }
 0x1e5   :  { %2751 = vmatprep.subr.bf16.mxu0 %v4118_v31  ;;  %2915 = vmatprep.subr.bf16.mxu1 %v4121_v32  ;;  %v4194_v31 = vld [vmem:[#allocation6 + $0x8] sm:$0xff]  }
 0x1e6   :  { %v4195_v32 = vld [vmem:[#allocation6 + $0x88] sm:$0xff]  }
 0x1e8   :  { %2752 = vmatpush1.bf16.msra.mxu0 %v4116_v33  ;;  %2916 = vmatpush1.bf16.msra.mxu1 %v4119_v34  ;;  %v4196_v33 = vld [vmem:[#allocation6 + $0x50] sm:$0xff]  }
 0x1e9   :  { %2753 = vmatprep.subr.bf16.mxu0 %v4124_v35  ;;  %2917 = vmatprep.subr.bf16.mxu1 %v4127_v37  ;;  %v4197_v34 = vld [vmem:[#allocation6 + $0xd0] sm:$0xff]  }
 0x1ea   :  { %v4198_v35 = vld [vmem:[#allocation6 + $0x10] sm:$0xff]  }
 0x1eb   :  { %v4199_v37 = vld [vmem:[#allocation6 + $0x90] sm:$0xff]  }
 0x1ec   :  { %2754 = vmatpush1.bf16.msra.mxu0 %v4122_v38  ;;  %2918 = vmatpush1.bf16.msra.mxu1 %v4125_v39  ;;  %v4200_v38 = vld [vmem:[#allocation6 + $0x58] sm:$0xff]  }
 0x1ed   :  { %2755 = vmatprep.subr.bf16.mxu0 %v4130_v40  ;;  %2919 = vmatprep.subr.bf16.mxu1 %v4133_v41  ;;  %v4201_v39 = vld [vmem:[#allocation6 + $0xd8] sm:$0xff]  }
 0x1ee   :  { %v4202_v40 = vld [vmem:[#allocation6 + $0x18] sm:$0xff]  }
 0x1ef   :  { %v4203_v41 = vld [vmem:[#allocation6 + $0x98] sm:$0xff]  }
 0x1f0   :  { %2756 = vmatpush1.bf16.msra.mxu0 %v4128_v43  ;;  %2920 = vmatpush1.bf16.msra.mxu1 %v4131_v44  ;;  %v4204_v43 = vld [vmem:[#allocation6 + $0x60] sm:$0xff]  }
 0x1f1   :  { %2757 = vmatprep.subr.bf16.mxu0 %v4136_v45  ;;  %2921 = vmatprep.subr.bf16.mxu1 %v4139_v46  ;;  %v4205_v44 = vld [vmem:[#allocation6 + $0xe0] sm:$0xff]  }
 0x1f2   :  { %v4206_v45 = vld [vmem:[#allocation6 + $0x20] sm:$0xff]  }
 0x1f3   :  { %v4207_v46 = vld [vmem:[#allocation6 + $0xa0] sm:$0xff]  }
 0x1f4   :  { %2758 = vmatpush1.bf16.msra.mxu0 %v4134_v47  ;;  %2922 = vmatpush1.bf16.msra.mxu1 %v4137_v36  ;;  %v4208_v47 = vld [vmem:[#allocation6 + $0x68] sm:$0xff]  }
 0x1f5   :  { %2759 = vmatprep.subr.bf16.mxu0 %v4142_v48  ;;  %2923 = vmatprep.subr.bf16.mxu1 %v4145_v49  ;;  %v4209_v36 = vld [vmem:[#allocation6 + $0xe8] sm:$0xff]  }
 0x1f6   :  { %v4210_v48 = vld [vmem:[#allocation6 + $0x28] sm:$0xff]  }
 0x1f7   :  { %v4211_v49 = vld [vmem:[#allocation6 + $0xa8] sm:$0xff]  }
 0x1f8   :  { %2760 = vmatpush1.bf16.msra.mxu0 %v4140_v23  ;;  %2924 = vmatpush1.bf16.msra.mxu1 %v4143_v50  ;;  %v4212_v23 = vld [vmem:[#allocation6 + $0x70] sm:$0xff]  }
 0x1f9   :  { %2761 = vmatprep.subr.bf16.mxu0 %v4148_v51  ;;  %2925 = vmatprep.subr.bf16.mxu1 %v4151_v52  ;;  %v4213_v50 = vld [vmem:[#allocation6 + $0xf0] sm:$0xff]  }
 0x1fa   :  { %v4214_v51 = vld [vmem:[#allocation6 + $0x30] sm:$0xff]  }
 0x1fb   :  { %v4215_v52 = vld [vmem:[#allocation6 + $0xb0] sm:$0xff]  }
 0x1fc   :  { %2762 = vmatpush1.bf16.msra.mxu0 %v4146_v53  ;;  %2926 = vmatpush1.bf16.msra.mxu1 %v4149_v54  ;;  %v4216_v53 = vld [vmem:[#allocation6 + $0x78] sm:$0xff]  }
 0x1fd   :  { %2763 = vmatprep.subr.bf16.mxu0 %v4154_v55  ;;  %2927 = vmatprep.subr.bf16.mxu1 %v4157_v56  ;;  %v4217_v54 = vld [vmem:[#allocation6 + $0xf8] sm:$0xff]  }
 0x1fe   :  { %v4218_v55 = vld [vmem:[#allocation6 + $0x38] sm:$0xff]  }
 0x1ff   :  { %v4219_v56 = vld [vmem:[#allocation6 + $0xb8] sm:$0xff]  }
 0x200   :  { %2764 = vmatpush1.bf16.msra.mxu0 %v4152_v57  ;;  %2928 = vmatpush1.bf16.msra.mxu1 %v4155_v58  ;;  %v1318_v57 = vld [vmem:[%s4457_s4] sm:$0xf] }
 0x201   :  { %2765 = vmatprep.subr.bf16.mxu0 %v4160_v59  ;;  %2929 = vmatprep.subr.bf16.mxu1 %v4163_v60  ;;  %v1323_v58 = vrot.slane %v1318_v57, %v204_v11  ;;  %v1331_v59 = vrot.slane %v1318_v57, %v212_v24  ;;  %v1327_v60 = vrot.slane %v1318_v57, %v208_v13 }
 0x204   :  { %2766 = vmatpush1.bf16.msra.mxu0 %v4158_v63  ;;  %2930 = vmatpush1.bf16.msra.mxu1 %v4161_v0  ;;  %v1335_v63 = vrot.slane %v1318_v57, %v216_v25 }
 0x205   :  { %2767 = vmatprep.subr.bf16.mxu0 %v4166_v1  ;;  %2931 = vmatprep.subr.bf16.mxu1 %v4169_v3 }
 0x208   :  { %2768 = vmatpush1.bf16.msra.mxu0 %v4164_v4  ;;  %2932 = vmatpush1.bf16.msra.mxu1 %v4167_v5 }
 0x209   :  { %2769 = vmatprep.subr.bf16.mxu0 %v4172_v7  ;;  %2933 = vmatprep.subr.bf16.mxu1 %v4175_v8 }
 0x20c   :  { %2770 = vmatpush1.bf16.msra.mxu0 %v4170_v9  ;;  %2934 = vmatpush1.bf16.msra.mxu1 %v4173_v42 }
 0x20d   :  { %2771 = vmatprep.subr.bf16.mxu0 %v4178_v15  ;;  %2935 = vmatprep.subr.bf16.mxu1 %v4181_v16 }
 0x210   :  { %2772 = vmatpush1.bf16.msra.mxu0 %v4176_v17  ;;  %2936 = vmatpush1.bf16.msra.mxu1 %v4179_v18 }
 0x211   :  { %2773 = vmatprep.subr.bf16.mxu0 %v4184_v19  ;;  %2937 = vmatprep.subr.bf16.mxu1 %v4187_v20  ;;  %v3690_v20 = vld [vmem:[%s4459_s6] ss:$0 sm:$0xff] }
 0x214   :  { %2774 = vmatpush1.bf16.msra.mxu0 %v4182_v21  ;;  %2938 = vmatpush1.bf16.msra.mxu1 %v4185_v22 }
 0x215   :  { %3723 = vmatprep.subr.bf16.mxu0 %v4188_v12  ;;  %3745 = vmatprep.subr.bf16.mxu1 %v4189_v27 }
 0x217   :  { %2776 = vmatmul.mubr.bf16.vlgmr.msra.gmra.mrb[8].mxu0 %v1060_v2  ;;  %2940 = vmatmul.mubr.bf16.vlgmr.msra.gmra.mrb[8].mxu1 %v1060_v2 }
 0x218   :  { %3724 = vmatpush3.bf16.msra.mxu0 %v4190_v28  ;;  %3746 = vmatpush3.bf16.msra.mxu1 %v4191_v29 }
 0x219   :  { %3725 = vmatprep.subr.bf16.mxu0 %v4192_v61  ;;  %3747 = vmatprep.subr.bf16.mxu1 %v4193_v30 }
 0x21c   :  { %3726 = vmatpush3.bf16.msra.mxu0 %v4194_v31  ;;  %3748 = vmatpush3.bf16.msra.mxu1 %v4195_v32 }
 0x21d   :  { %3727 = vmatprep.subr.bf16.mxu0 %v4196_v33  ;;  %3749 = vmatprep.subr.bf16.mxu1 %v4197_v34 }
 0x220   :  { %3728 = vmatpush3.bf16.msra.mxu0 %v4198_v35  ;;  %3750 = vmatpush3.bf16.msra.mxu1 %v4199_v37 }
 0x221   :  { %3729 = vmatprep.subr.bf16.mxu0 %v4200_v38  ;;  %3751 = vmatprep.subr.bf16.mxu1 %v4201_v39 }
 0x224   :  { %3730 = vmatpush3.bf16.msra.mxu0 %v4202_v40  ;;  %3752 = vmatpush3.bf16.msra.mxu1 %v4203_v41 }
 0x225   :  { %3731 = vmatprep.subr.bf16.mxu0 %v4204_v43  ;;  %3753 = vmatprep.subr.bf16.mxu1 %v4205_v44 }
 0x228   :  { %3732 = vmatpush3.bf16.msra.mxu0 %v4206_v45  ;;  %3754 = vmatpush3.bf16.msra.mxu1 %v4207_v46 }
 0x229   :  { %3733 = vmatprep.subr.bf16.mxu0 %v4208_v47  ;;  %3755 = vmatprep.subr.bf16.mxu1 %v4209_v36 }
 0x22c   :  { %3734 = vmatpush3.bf16.msra.mxu0 %v4210_v48  ;;  %3756 = vmatpush3.bf16.msra.mxu1 %v4211_v49 }
 0x22d   :  { %3735 = vmatprep.subr.bf16.mxu0 %v4212_v23  ;;  %3757 = vmatprep.subr.bf16.mxu1 %v4213_v50 }
 0x230   :  { %3736 = vmatpush3.bf16.msra.mxu0 %v4214_v51  ;;  %3758 = vmatpush3.bf16.msra.mxu1 %v4215_v52 }
 0x231   :  { %3737 = vmatprep.subr.bf16.mxu0 %v4216_v53  ;;  %3759 = vmatprep.subr.bf16.mxu1 %v4217_v54 }
 0x234   :  { %3738 = vmatpush3.bf16.msra.mxu0 %v4218_v55  ;;  %3760 = vmatpush3.bf16.msra.mxu1 %v4219_v56 }
 0x2ea   :  { %v2777_v0 = vpop.f32.mrb[8].mxu0  ;;  %v2941_v1 = vpop.f32.mrb[8].mxu1 }
 0x2eb   :  { %v3767_v3 = vadd.f32 %v2777_v0, %v1323_v58  ;;  %v3769_v4 = vadd.f32 %v2941_v1, %v1331_v59  ;;  %v2779_v5 = vpop.f32.mrb[9].mxu0  ;;  %v2943_v6 = vpop.f32.mrb[9].mxu1 }
 0x2ec   :  { %v3768_v7 = vadd.f32 %v2779_v5, %v1327_v60  ;;  %v3770_v8 = vadd.f32 %v2943_v6, %v1335_v63  ;;  %v2781_v9 = vpop.f32.mrb[10].mxu0  ;;  %v2945_v42 = vpop.f32.mrb[10].mxu1 }
 0x2ed   :  { %v2948_v11 = vmax.f32 %v3767_v3, 0.0  ;;  %v2950_v14 = vmax.f32 %v3769_v4, 0.0  ;;  %v2782_v15 = vpop.f32.mrb[11].mxu0  ;;  %v2946_v24 = vpop.f32.mrb[11].mxu1 }
 0x2ee   :  { %v2949_v16 = vmax.f32 %v3768_v7, 0.0  ;;  %v2951_v17 = vmax.f32 %v3770_v8, 0.0 }
 0x2ef   :  { %v2952_v10 = vpack.c.bf16 %v2948_v11, %v2948_v11  ;;  %v2954_v25 = vpack.c.bf16 %v2950_v14, %v2950_v14 }
 0x2f0   :  { %v2953_v13 = vpack.c.bf16 %v2949_v16, %v2949_v16  ;;  %v2955_v18 = vpack.c.bf16 %v2951_v17, %v2951_v17 }
 0x2f2   :  { %3251 = vmatprep.mubr.bf16.mxu0 %v2953_v13  ;;  %3291 = vmatprep.mubr.bf16.mxu1 %v2955_v18 }
 0x2f3   :  { %3252 = vmatmul.mubr.bf16.vlgmr.msra.gmra.mrb[12].mxu0 %v2952_v10  ;;  %3292 = vmatmul.mubr.bf16.vlgmr.msra.gmra.mrb[12].mxu1 %v2954_v25 }
 0x3c6   :  { %v3739_v62 = vpop.f32.mrb[12].mxu0  ;;  %v3761_v19 = vpop.f32.mrb[12].mxu1 }
 0x3c7   :  { %v3740_v21 = vpop.f32.mrb[13].mxu0  ;;  %v3762_v22 = vpop.f32.mrb[13].mxu1 }
 0x3c8   :  { %v3741_v26 = vadd.f32 %v3740_v21, %v3739_v62  ;;  %v3763_v12 = vadd.f32 %v3762_v22, %v3761_v19  ;;  %v3742_v27 = vpop.f32.mrb[14].mxu0  ;;  %v3764_v28 = vpop.f32.mrb[14].mxu1 }
 0x3c9   :  { %v3743_v29 = vpop.f32.mrb[15].mxu0  ;;  %v3765_v2 = vpop.f32.mrb[15].mxu1 }
 0x3ca   :  { %v3254_v61 = vadd.f32 %v3741_v26, %v3690_v20 }
 0x3cc   :  { %v3294_v30 = vadd.f32 %v3763_v12, %v3254_v61 }
 0x3ce   :  { %3299 = vst [vmem:[%s4460_s7] sm:$0xff] %v3294_v30 }
 0x3cf   :  { %3304 = vsyncpa [#allocation3], 1 }
 0x3d0   :  { %3305 = vsyncpa [#allocation5], 1 }

</bundles_post_ra>
